<compile_context>
chip_gen: v7x
topology: tpu7x:2x2x1
jax: 0.10.0
libtpu: 0.0.40
codegen_flags: <defaults>
</compile_context>

<pallas_src>
import jax
import jax.numpy as jnp
from jax import lax
from jax.experimental import pallas as pl
from jax.experimental.pallas import tpu as pltpu


def _make_kernel(Bt, Ct, C, H, W, K):
    P = K // 2
    Wp = W + 2 * P
    inv_c = float(1.0 / C)

    def kernel(x_ref, w_ref, b_ref, o_ref,
               sum_ref, max_ref, pad_avg_ref, pad_max_ref):
        ci = pl.program_id(1)
        nc = pl.num_programs(1)

        # ----- init the running channel statistics on the first C step -----
        @pl.when(ci == 0)
        def _():
            sum_ref[...] = jnp.zeros((Bt, H, W), jnp.float32)
            max_ref[...] = jnp.full((Bt, H, W), -jnp.inf, jnp.float32)

        # ----- streamed channel reduction over this (Bt, Ct, H, W) block -----
        # One (Bt, H, W) slice per iteration: no whole-block materialization,
        # no vreg spills competing with the conv.
        s = sum_ref[...]
        m = max_ref[...]
        if Ct <= 8:
            for c in range(Ct):                       # static, fully visible to LLO
                xc = x_ref[:, c].astype(jnp.float32)  # (Bt, H, W)
                s = s + xc
                m = jnp.maximum(m, xc)
        else:
            def body(c, carry):
                sc, mc = carry
                xc = x_ref[:, pl.ds(c, 1)][:, 0].astype(jnp.float32)
                return sc + xc, jnp.maximum(mc, xc)
            s, m = lax.fori_loop(0, Ct, body, (s, m))
        sum_ref[...] = s
        max_ref[...] = m

        # ----- last C step: pad, 7x7 conv (PyTorch cross-correlation), sigmoid -----
        @pl.when(ci == nc - 1)
        def _():
            avg = s * inv_c
            mx = m

            # Zero only the 2P border strips (interior is fully overwritten).
            # Scratch is per-TensorCore, and this runs on every finalize step,
            # so borders are always valid even with a megacore-split grid.
            zeros_row = jnp.zeros((Bt, P, Wp), jnp.float32)
            zeros_col = jnp.zeros((Bt, H, P), jnp.float32)
            for pref, data in ((pad_avg_ref, avg), (pad_max_ref, mx)):
                pref[:, 0:P, :] = zeros_row
                pref[:, P + H:, :] = zeros_row
                pref[:, P:P + H, 0:P] = zeros_col
                pref[:, P:P + H, P + W:] = zeros_col
                pref[:, P:P + H, P:P + W] = data

            # 2 -> 1 channel KxK conv.  Per (channel, dy): ONE slab load from the
            # padded scratch, then 7 value-level dx slices + FMAs.  One accumulator
            # per input channel breaks the serial VALU dependence chain.
            # TODO(synk): banded-Toeplitz MXU offload of the dx taps (v6e/v7x) was
            # not applied to keep the lowering path simple/robust.
            accs = []
            for ch, pref in enumerate((pad_avg_ref, pad_max_ref)):
                base = ch * K * K
                acc = jnp.zeros((Bt, H, W), jnp.float32)
                for dy in range(K):
                    slab = pref[:, dy:dy + H, :]          # (Bt, H, Wp), one load
                    for dx in range(K):
                        w = w_ref[base + dy * K + dx]     # SMEM scalar
                        acc = acc + w * slab[:, :, dx:dx + W]
                accs.append(acc)

            sp = accs[0] + accs[1] + b_ref[0]
            o_ref[...] = jax.nn.sigmoid(sp).astype(o_ref.dtype)   # single store

    return kernel


def _round_up(v, m):
    return ((v + m - 1) // m) * m


def _pick_tiles(B, C, H, W, K, x_dtype):
    """Choose (batch_tile, channel_tile, vmem_limit_bytes).

    Footprints use the *tiled* sizes (lane dim rounded to 128, sublane dim to
    8/16 depending on dtype) so small-W shapes do not blow past real VMEM, and
    the budget comes from the chip's capacity (64 MiB/TC on v7x, 128 on v5e/v6e).
    """
    P = K // 2
    try:
        cap = int(pltpu.get_tpu_info().vmem_capacity_bytes)
    except Exception:
        cap = 128 << 20
    vmem_limit = min(cap // 2, 64 << 20)       # 64 MiB v5e/v6e, 32 MiB v7x
    budget = vmem_limit // 3                   # headroom for compiler temporaries

    x_item = jnp.dtype(x_dtype).itemsize
    x_sub = 8 * max(1, 4 // x_item)            # sublane tile: 8 (f32), 16 (bf16)

    w_lanes = _round_up(W, 128)
    wp_lanes = _round_up(W + 2 * P, 128)
    h_sub32 = _round_up(H, 8)
    h_subx = _round_up(H, x_sub)
    hp_sub = _round_up(H + 2 * P, 8)

    def fixed_bytes(bt):                       # Ct-independent footprint
        out = 2 * bt * h_sub32 * w_lanes * 4           # double-buffered output
        stats = 2 * bt * h_sub32 * w_lanes * 4         # sum + max scratch
        pads = 2 * bt * hp_sub * wp_lanes * 4          # padded avg/max scratch
        return out + stats + pads

    def in_bytes(bt, ct):                      # double-buffered x block
        return 2 * bt * ct * h_subx * w_lanes * x_item

    div_b = [d for d in range(1, B + 1) if B % d == 0]
    div_c = [d for d in range(1, C + 1) if C % d == 0]

    fit_b = [d for d in div_b if fixed_bytes(d) + in_bytes(d, 1) <= budget] or [1]
    # Keep >= 2 batch steps when possible so megacore parts (v7x) can split the
    # "parallel" batch axis across both TensorCores.
    pref_b = [d for d in fit_b if B // d >= 2] or fit_b
    Bt = max(pref_b)

    fit_c = [d for d in div_c if fixed_bytes(Bt) + in_bytes(Bt, d) <= budget] or [1]
    Ct = max(fit_c)

    # Give the software pipeline (and each TensorCore) a few grid steps.
    while (B // Bt) * (C // Ct) < 8:
        smaller_c = [d for d in div_c if d < Ct]
        if smaller_c:
            Ct = max(smaller_c)
            continue
        smaller_b = [d for d in fit_b if d < Bt]
        if smaller_b:
            Bt = max(smaller_b)
            continue
        break
    return Bt, Ct, vmem_limit


def spatial_attention(x, w_conv, b_conv, *, kernel_size=7,
                      batch_tile=None, channel_tile=None):
    """x: (B, C, H, W); w_conv: (1, 2, K, K); b_conv: (1,). Returns (B, 1, H, W)."""
    B, C, H, W = x.shape
    K = kernel_size
    P = K // 2

    # keep x in its native dtype (bf16 upstream -> half the dominant HBM stream)
    w_flat = w_conv.reshape(-1).astype(jnp.float32)     # (2*K*K,)
    b_flat = b_conv.reshape(-1).astype(jnp.float32)     # (1,)

    Bt, Ct, vmem_limit = _pick_tiles(B, C, H, W, K, x.dtype)
    if batch_tile is not None:
        Bt = batch_tile
    if channel_tile is not None:
        Ct = channel_tile
    assert B % Bt == 0 and C % Ct == 0, "tiles must divide batch/channel dims"

    kernel = _make_kernel(Bt, Ct, C, H, W, K)

    grid_spec = pltpu.PrefetchScalarGridSpec(
        num_scalar_prefetch=0,
        grid=(B // Bt, C // Ct),                        # C-reduction axis last
        in_specs=[
            pl.BlockSpec((Bt, Ct, H, W), lambda b, c: (b, c, 0, 0)),
            pl.BlockSpec(memory_space=pltpu.MemorySpace.SMEM),   # conv weights
            pl.BlockSpec(memory_space=pltpu.MemorySpace.SMEM),   # conv bias
        ],
        out_specs=pl.BlockSpec((Bt, H, W), lambda b, c: (b, 0, 0)),
        scratch_shapes=[
            pltpu.VMEM((Bt, H, W), jnp.float32),                 # running channel sum
            pltpu.VMEM((Bt, H, W), jnp.float32),                 # running channel max
            pltpu.VMEM((Bt, H + 2 * P, W + 2 * P), jnp.float32),  # padded avg map
            pltpu.VMEM((Bt, H + 2 * P, W + 2 * P), jnp.float32),  # padded max map
        ],
    )

    out = pl.pallas_call(
        kernel,
        out_shape=jax.ShapeDtypeStruct((B, H, W), x.dtype),
        grid_spec=grid_spec,
        compiler_params=pltpu.CompilerParams(
            dimension_semantics=("parallel", "arbitrary"),
            vmem_limit_bytes=int(vmem_limit),
        ),
    )(x, w_flat, b_flat)

    return out[:, None, :, :]                            # (B, 1, H, W), like PyTorch


def _reference(x, w_conv, b_conv, k):
    p = k // 2
    avg = jnp.mean(x, axis=1, keepdims=True)
    mx = jnp.max(x, axis=1, keepdims=True)
    cat = jnp.concatenate([avg, mx], axis=1)             # (B, 2, H, W)
    sp = lax.conv_general_dilated(
        cat, w_conv, (1, 1), ((p, p), (p, p)),
        dimension_numbers=("NCHW", "OIHW", "NCHW")) + b_conv.reshape(1, 1, 1, 1)
    return jax.nn.sigmoid(sp)                            # (B, 1, H, W)


if __name__ == "__main__":
    B, C, H, W = 2, 4, 16, 16
    K = 7

    key = jax.random.PRNGKey(0)
    kx, kw, kb = jax.random.split(key, 3)
    x = jax.random.normal(kx, (B, C, H, W), dtype=jnp.float32)
    # same parameter shapes as nn.Conv2d(2, 1, 7, padding=3) (weight + bias)
    w_conv = jax.random.normal(kw, (1, 2, K, K), dtype=jnp.float32) * 0.1
    b_conv = jax.random.normal(kb, (1,), dtype=jnp.float32) * 0.1

    out = spatial_attention(x, w_conv, b_conv, kernel_size=K)
    out = jax.block_until_ready(out)

    ref = _reference(x, w_conv, b_conv, K)
    assert out.shape == (B, 1, H, W)
    assert jnp.allclose(out, ref, atol=1e-5, rtol=1e-5), "mismatch vs pure-JAX reference"
    print("KERNEL_OK")
</pallas_src>

<mosaic_0001>
module attributes {stable_mosaic.version = 11 : i64} {
  func.func @kernel(%arg0: i32, %arg1: i32, %arg2: memref<1x1x16x16xf32, #tpu.memory_space<vmem>>, %arg3: memref<98xf32, #tpu.memory_space<smem>>, %arg4: memref<1xf32, #tpu.memory_space<smem>>, %arg5: memref<1x16x16xf32, #tpu.memory_space<vmem>>, %arg6: memref<1x16x16xf32, #tpu.memory_space<vmem>>, %arg7: memref<1x16x16xf32, #tpu.memory_space<vmem>>, %arg8: memref<1x22x22xf32, #tpu.memory_space<vmem>>, %arg9: memref<1x22x22xf32, #tpu.memory_space<vmem>>) attributes {dimension_semantics = [#tpu.dimension_semantics<parallel>, #tpu.dimension_semantics<arbitrary>], iteration_bounds = array<i64: 2, 4>, scalar_prefetch = 0 : i64, scratch_operands = 4 : i64, tpu.core_type = #tpu.core_type<tc>, window_params = [{transform_indices = @transform_0, window_bounds = array<i64: 1, 1, 16, 16>}, {transform_indices = @transform_1, window_bounds = array<i64: 98>}, {transform_indices = @transform_2, window_bounds = array<i64: 1>}, {transform_indices = @transform_3, window_bounds = array<i64: 1, 16, 16>}]} {
    %c0_i32 = arith.constant 0 : i32
    %0 = arith.cmpi eq, %arg1, %c0_i32 : i32
    %1 = arith.extui %0 : i1 to i32
    %c0_i32_0 = arith.constant 0 : i32
    %2 = arith.cmpi ne, %1, %c0_i32_0 : i32
    scf.if %2 {
      %cst = arith.constant 0.000000e+00 : f32
      %14 = vector.broadcast %cst : f32 to vector<1x16x16xf32>
      %c0_17 = arith.constant 0 : index
      %c0_18 = arith.constant 0 : index
      %c0_19 = arith.constant 0 : index
      %15 = vector.load %arg6[%c0_17, %c0_18, %c0_19] : memref<1x16x16xf32, #tpu.memory_space<vmem>>, vector<1x16x16xf32>
      tpu.vector_store %arg6[%c0_17, %c0_18, %c0_19], %14 {strides = array<i32>} : memref<1x16x16xf32, #tpu.memory_space<vmem>>, vector<1x16x16xf32>,
      %cst_20 = arith.constant 0xFF800000 : f32
      %16 = vector.broadcast %cst_20 : f32 to vector<1x16x16xf32>
      %c0_21 = arith.constant 0 : index
      %c0_22 = arith.constant 0 : index
      %c0_23 = arith.constant 0 : index
      %17 = vector.load %arg7[%c0_21, %c0_22, %c0_23] : memref<1x16x16xf32, #tpu.memory_space<vmem>>, vector<1x16x16xf32>
      tpu.vector_store %arg7[%c0_21, %c0_22, %c0_23], %16 {strides = array<i32>} : memref<1x16x16xf32, #tpu.memory_space<vmem>>, vector<1x16x16xf32>,
    } else {
    }
    %c0 = arith.constant 0 : index
    %c0_1 = arith.constant 0 : index
    %c0_2 = arith.constant 0 : index
    %3 = vector.load %arg6[%c0, %c0_1, %c0_2] : memref<1x16x16xf32, #tpu.memory_space<vmem>>, vector<1x16x16xf32>
    %c0_3 = arith.constant 0 : index
    %c0_4 = arith.constant 0 : index
    %c0_5 = arith.constant 0 : index
    %4 = vector.load %arg7[%c0_3, %c0_4, %c0_5] : memref<1x16x16xf32, #tpu.memory_space<vmem>>, vector<1x16x16xf32>
    %c0_6 = arith.constant 0 : index
    %c0_7 = arith.constant 0 : index
    %c0_8 = arith.constant 0 : index
    %c0_9 = arith.constant 0 : index
    %5 = vector.load %arg2[%c0_6, %c0_7, %c0_8, %c0_9] : memref<1x1x16x16xf32, #tpu.memory_space<vmem>>, vector<1x1x16x16xf32>
    %6 = vector.shape_cast %5 : vector<1x1x16x16xf32> to vector<1x16x16xf32>
    %7 = arith.addf %3, %6 : vector<1x16x16xf32>
    %8 = arith.maximumf %4, %6 : vector<1x16x16xf32>
    %c0_10 = arith.constant 0 : index
    %c0_11 = arith.constant 0 : index
    %c0_12 = arith.constant 0 : index
    %9 = vector.load %arg6[%c0_10, %c0_11, %c0_12] : memref<1x16x16xf32, #tpu.memory_space<vmem>>, vector<1x16x16xf32>
    tpu.vector_store %arg6[%c0_10, %c0_11, %c0_12], %7 {strides = array<i32>} : memref<1x16x16xf32, #tpu.memory_space<vmem>>, vector<1x16x16xf32>,
    %c0_13 = arith.constant 0 : index
    %c0_14 = arith.constant 0 : index
    %c0_15 = arith.constant 0 : index
    %10 = vector.load %arg7[%c0_13, %c0_14, %c0_15] : memref<1x16x16xf32, #tpu.memory_space<vmem>>, vector<1x16x16xf32>
    tpu.vector_store %arg7[%c0_13, %c0_14, %c0_15], %8 {strides = array<i32>} : memref<1x16x16xf32, #tpu.memory_space<vmem>>, vector<1x16x16xf32>,
    %c3_i32 = arith.constant 3 : i32
    %11 = arith.cmpi eq, %arg1, %c3_i32 : i32
    %12 = arith.extui %11 : i1 to i32
    %c0_i32_16 = arith.constant 0 : i32
    %13 = arith.cmpi ne, %12, %c0_i32_16 : i32
    scf.if %13 {
      %cst = arith.constant 2.500000e-01 : f32
      %14 = vector.broadcast %cst : f32 to vector<1x16x16xf32>
      %15 = arith.mulf %7, %14 : vector<1x16x16xf32>
      %cst_17 = arith.constant 0.000000e+00 : f32
      %16 = vector.broadcast %cst_17 : f32 to vector<1x3x22xf32>
      %cst_18 = arith.constant 0.000000e+00 : f32
      %17 = vector.broadcast %cst_18 : f32 to vector<1x16x3xf32>
      %c0_19 = arith.constant 0 : index
      %c0_20 = arith.constant 0 : index
      %c0_21 = arith.constant 0 : index
      %18 = vector.load %arg8[%c0_19, %c0_20, %c0_21] : memref<1x22x22xf32, #tpu.memory_space<vmem>>, vector<1x3x22xf32>
      tpu.vector_store %arg8[%c0_19, %c0_20, %c0_21], %16 {strides = array<i32>} : memref<1x22x22xf32, #tpu.memory_space<vmem>>, vector<1x3x22xf32>,
      %c0_22 = arith.constant 0 : index
      %c19 = arith.constant 19 : index
      %c0_23 = arith.constant 0 : index
      %19 = vector.load %arg8[%c0_22, %c19, %c0_23] : memref<1x22x22xf32, #tpu.memory_space<vmem>>, vector<1x3x22xf32>
      tpu.vector_store %arg8[%c0_22, %c19, %c0_23], %16 {strides = array<i32>} : memref<1x22x22xf32, #tpu.memory_space<vmem>>, vector<1x3x22xf32>,
      %c0_24 = arith.constant 0 : index
      %c3 = arith.constant 3 : index
      %c0_25 = arith.constant 0 : index
      %20 = vector.load %arg8[%c0_24, %c3, %c0_25] : memref<1x22x22xf32, #tpu.memory_space<vmem>>, vector<1x16x3xf32>
      tpu.vector_store %arg8[%c0_24, %c3, %c0_25], %17 {strides = array<i32>} : memref<1x22x22xf32, #tpu.memory_space<vmem>>, vector<1x16x3xf32>,
      %c0_26 = arith.constant 0 : index
      %c3_27 = arith.constant 3 : index
      %c19_28 = arith.constant 19 : index
      %21 = vector.load %arg8[%c0_26, %c3_27, %c19_28] : memref<1x22x22xf32, #tpu.memory_space<vmem>>, vector<1x16x3xf32>
      tpu.vector_store %arg8[%c0_26, %c3_27, %c19_28], %17 {strides = array<i32>} : memref<1x22x22xf32, #tpu.memory_space<vmem>>, vector<1x16x3xf32>,
      %c0_29 = arith.constant 0 : index
      %c3_30 = arith.constant 3 : index
      %c3_31 = arith.constant 3 : index
      %22 = vector.load %arg8[%c0_29, %c3_30, %c3_31] : memref<1x22x22xf32, #tpu.memory_space<vmem>>, vector<1x16x16xf32>
      tpu.vector_store %arg8[%c0_29, %c3_30, %c3_31], %15 {strides = array<i32>} : memref<1x22x22xf32, #tpu.memory_space<vmem>>, vector<1x16x16xf32>,
      %c0_32 = arith.constant 0 : index
      %c0_33 = arith.constant 0 : index
      %c0_34 = arith.constant 0 : index
      %23 = vector.load %arg9[%c0_32, %c0_33, %c0_34] : memref<1x22x22xf32, #tpu.memory_space<vmem>>, vector<1x3x22xf32>
      tpu.vector_store %arg9[%c0_32, %c0_33, %c0_34], %16 {strides = array<i32>} : memref<1x22x22xf32, #tpu.memory_space<vmem>>, vector<1x3x22xf32>,
      %c0_35 = arith.constant 0 : index
      %c19_36 = arith.constant 19 : index
      %c0_37 = arith.constant 0 : index
      %24 = vector.load %arg9[%c0_35, %c19_36, %c0_37] : memref<1x22x22xf32, #tpu.memory_space<vmem>>, vector<1x3x22xf32>
      tpu.vector_store %arg9[%c0_35, %c19_36, %c0_37], %16 {strides = array<i32>} : memref<1x22x22xf32, #tpu.memory_space<vmem>>, vector<1x3x22xf32>,
      %c0_38 = arith.constant 0 : index
      %c3_39 = arith.constant 3 : index
      %c0_40 = arith.constant 0 : index
      %25 = vector.load %arg9[%c0_38, %c3_39, %c0_40] : memref<1x22x22xf32, #tpu.memory_space<vmem>>, vector<1x16x3xf32>
      tpu.vector_store %arg9[%c0_38, %c3_39, %c0_40], %17 {strides = array<i32>} : memref<1x22x22xf32, #tpu.memory_space<vmem>>, vector<1x16x3xf32>,
      %c0_41 = arith.constant 0 : index
      %c3_42 = arith.constant 3 : index
      %c19_43 = arith.constant 19 : index
      %26 = vector.load %arg9[%c0_41, %c3_42, %c19_43] : memref<1x22x22xf32, #tpu.memory_space<vmem>>, vector<1x16x3xf32>
      tpu.vector_store %arg9[%c0_41, %c3_42, %c19_43], %17 {strides = array<i32>} : memref<1x22x22xf32, #tpu.memory_space<vmem>>, vector<1x16x3xf32>,
      %c0_44 = arith.constant 0 : index
      %c3_45 = arith.constant 3 : index
      %c3_46 = arith.constant 3 : index
      %27 = vector.load %arg9[%c0_44, %c3_45, %c3_46] : memref<1x22x22xf32, #tpu.memory_space<vmem>>, vector<1x16x16xf32>
      tpu.vector_store %arg9[%c0_44, %c3_45, %c3_46], %8 {strides = array<i32>} : memref<1x22x22xf32, #tpu.memory_space<vmem>>, vector<1x16x16xf32>,
      %cst_47 = arith.constant 0.000000e+00 : f32
      %28 = vector.broadcast %cst_47 : f32 to vector<1x16x16xf32>
      %c0_48 = arith.constant 0 : index
      %c0_49 = arith.constant 0 : index
      %c0_50 = arith.constant 0 : index
      %29 = vector.load %arg8[%c0_48, %c0_49, %c0_50] : memref<1x22x22xf32, #tpu.memory_space<vmem>>, vector<1x16x22xf32>
      %c0_51 = arith.constant 0 : index
      %30 = memref.load %arg3[%c0_51] : memref<98xf32, #tpu.memory_space<smem>>
      %31 = vector.extract_strided_slice %29 {offsets = [0, 0, 0], sizes = [1, 16, 16], strides = [1, 1, 1]} : vector<1x16x22xf32> to vector<1x16x16xf32>
      %32 = vector.broadcast %30 : f32 to vector<1x16x16xf32>
      %33 = arith.mulf %32, %31 : vector<1x16x16xf32>
      %34 = arith.addf %28, %33 : vector<1x16x16xf32>
      %c1 = arith.constant 1 : index
      %35 = memref.load %arg3[%c1] : memref<98xf32, #tpu.memory_space<smem>>
      %36 = vector.extract_strided_slice %29 {offsets = [0, 0, 1], sizes = [1, 16, 16], strides = [1, 1, 1]} : vector<1x16x22xf32> to vector<1x16x16xf32>
      %37 = vector.broadcast %35 : f32 to vector<1x16x16xf32>
      %38 = arith.mulf %37, %36 : vector<1x16x16xf32>
      %39 = arith.addf %34, %38 : vector<1x16x16xf32>
      %c2 = arith.constant 2 : index
      %40 = memref.load %arg3[%c2] : memref<98xf32, #tpu.memory_space<smem>>
      %41 = vector.extract_strided_slice %29 {offsets = [0, 0, 2], sizes = [1, 16, 16], strides = [1, 1, 1]} : vector<1x16x22xf32> to vector<1x16x16xf32>
      %42 = vector.broadcast %40 : f32 to vector<1x16x16xf32>
      %43 = arith.mulf %42, %41 : vector<1x16x16xf32>
      %44 = arith.addf %39, %43 : vector<1x16x16xf32>
      %c3_52 = arith.constant 3 : index
      %45 = memref.load %arg3[%c3_52] : memref<98xf32, #tpu.memory_space<smem>>
      %46 = vector.extract_strided_slice %29 {offsets = [0, 0, 3], sizes = [1, 16, 16], strides = [1, 1, 1]} : vector<1x16x22xf32> to vector<1x16x16xf32>
      %47 = vector.broadcast %45 : f32 to vector<1x16x16xf32>
      %48 = arith.mulf %47, %46 : vector<1x16x16xf32>
      %49 = arith.addf %44, %48 : vector<1x16x16xf32>
      %c4 = arith.constant 4 : index
      %50 = memref.load %arg3[%c4] : memref<98xf32, #tpu.memory_space<smem>>
      %51 = vector.extract_strided_slice %29 {offsets = [0, 0, 4], sizes = [1, 16, 16], strides = [1, 1, 1]} : vector<1x16x22xf32> to vector<1x16x16xf32>
      %52 = vector.broadcast %50 : f32 to vector<1x16x16xf32>
      %53 = arith.mulf %52, %51 : vector<1x16x16xf32>
      %54 = arith.addf %49, %53 : vector<1x16x16xf32>
      %c5 = arith.constant 5 : index
      %55 = memref.load %arg3[%c5] : memref<98xf32, #tpu.memory_space<smem>>
      %56 = vector.extract_strided_slice %29 {offsets = [0, 0, 5], sizes = [1, 16, 16], strides = [1, 1, 1]} : vector<1x16x22xf32> to vector<1x16x16xf32>
      %57 = vector.broadcast %55 : f32 to vector<1x16x16xf32>
      %58 = arith.mulf %57, %56 : vector<1x16x16xf32>
      %59 = arith.addf %54, %58 : vector<1x16x16xf32>
      %c6 = arith.constant 6 : index
      %60 = memref.load %arg3[%c6] : memref<98xf32, #tpu.memory_space<smem>>
      %61 = vector.extract_strided_slice %29 {offsets = [0, 0, 6], sizes = [1, 16, 16], strides = [1, 1, 1]} : vector<1x16x22xf32> to vector<1x16x16xf32>
      %62 = vector.broadcast %60 : f32 to vector<1x16x16xf32>
      %63 = arith.mulf %62, %61 : vector<1x16x16xf32>
      %64 = arith.addf %59, %63 : vector<1x16x16xf32>
      %c0_53 = arith.constant 0 : index
      %c1_54 = arith.constant 1 : index
      %c0_55 = arith.constant 0 : index
      %65 = vector.load %arg8[%c0_53, %c1_54, %c0_55] : memref<1x22x22xf32, #tpu.memory_space<vmem>>, vector<1x16x22xf32>
      %c7 = arith.constant 7 : index
      %66 = memref.load %arg3[%c7] : memref<98xf32, #tpu.memory_space<smem>>
      %67 = vector.extract_strided_slice %65 {offsets = [0, 0, 0], sizes = [1, 16, 16], strides = [1, 1, 1]} : vector<1x16x22xf32> to vector<1x16x16xf32>
      %68 = vector.broadcast %66 : f32 to vector<1x16x16xf32>
      %69 = arith.mulf %68, %67 : vector<1x16x16xf32>
      %70 = arith.addf %64, %69 : vector<1x16x16xf32>
      %c8 = arith.constant 8 : index
      %71 = memref.load %arg3[%c8] : memref<98xf32, #tpu.memory_space<smem>>
      %72 = vector.extract_strided_slice %65 {offsets = [0, 0, 1], sizes = [1, 16, 16], strides = [1, 1, 1]} : vector<1x16x22xf32> to vector<1x16x16xf32>
      %73 = vector.broadcast %71 : f32 to vector<1x16x16xf32>
      %74 = arith.mulf %73, %72 : vector<1x16x16xf32>
      %75 = arith.addf %70, %74 : vector<1x16x16xf32>
      %c9 = arith.constant 9 : index
      %76 = memref.load %arg3[%c9] : memref<98xf32, #tpu.memory_space<smem>>
      %77 = vector.extract_strided_slice %65 {offsets = [0, 0, 2], sizes = [1, 16, 16], strides = [1, 1, 1]} : vector<1x16x22xf32> to vector<1x16x16xf32>
      %78 = vector.broadcast %76 : f32 to vector<1x16x16xf32>
      %79 = arith.mulf %78, %77 : vector<1x16x16xf32>
      %80 = arith.addf %75, %79 : vector<1x16x16xf32>
      %c10 = arith.constant 10 : index
      %81 = memref.load %arg3[%c10] : memref<98xf32, #tpu.memory_space<smem>>
      %82 = vector.extract_strided_slice %65 {offsets = [0, 0, 3], sizes = [1, 16, 16], strides = [1, 1, 1]} : vector<1x16x22xf32> to vector<1x16x16xf32>
      %83 = vector.broadcast %81 : f32 to vector<1x16x16xf32>
      %84 = arith.mulf %83, %82 : vector<1x16x16xf32>
      %85 = arith.addf %80, %84 : vector<1x16x16xf32>
      %c11 = arith.constant 11 : index
      %86 = memref.load %arg3[%c11] : memref<98xf32, #tpu.memory_space<smem>>
      %87 = vector.extract_strided_slice %65 {offsets = [0, 0, 4], sizes = [1, 16, 16], strides = [1, 1, 1]} : vector<1x16x22xf32> to vector<1x16x16xf32>
      %88 = vector.broadcast %86 : f32 to vector<1x16x16xf32>
      %89 = arith.mulf %88, %87 : vector<1x16x16xf32>
      %90 = arith.addf %85, %89 : vector<1x16x16xf32>
      %c12 = arith.constant 12 : index
      %91 = memref.load %arg3[%c12] : memref<98xf32, #tpu.memory_space<smem>>
      %92 = vector.extract_strided_slice %65 {offsets = [0, 0, 5], sizes = [1, 16, 16], strides = [1, 1, 1]} : vector<1x16x22xf32> to vector<1x16x16xf32>
      %93 = vector.broadcast %91 : f32 to vector<1x16x16xf32>
      %94 = arith.mulf %93, %92 : vector<1x16x16xf32>
      %95 = arith.addf %90, %94 : vector<1x16x16xf32>
      %c13 = arith.constant 13 : index
      %96 = memref.load %arg3[%c13] : memref<98xf32, #tpu.memory_space<smem>>
      %97 = vector.extract_strided_slice %65 {offsets = [0, 0, 6], sizes = [1, 16, 16], strides = [1, 1, 1]} : vector<1x16x22xf32> to vector<1x16x16xf32>
      %98 = vector.broadcast %96 : f32 to vector<1x16x16xf32>
      %99 = arith.mulf %98, %97 : vector<1x16x16xf32>
      %100 = arith.addf %95, %99 : vector<1x16x16xf32>
      %c0_56 = arith.constant 0 : index
      %c2_57 = arith.constant 2 : index
      %c0_58 = arith.constant 0 : index
      %101 = vector.load %arg8[%c0_56, %c2_57, %c0_58] : memref<1x22x22xf32, #tpu.memory_space<vmem>>, vector<1x16x22xf32>
      %c14 = arith.constant 14 : index
      %102 = memref.load %arg3[%c14] : memref<98xf32, #tpu.memory_space<smem>>
      %103 = vector.extract_strided_slice %101 {offsets = [0, 0, 0], sizes = [1, 16, 16], strides = [1, 1, 1]} : vector<1x16x22xf32> to vector<1x16x16xf32>
      %104 = vector.broadcast %102 : f32 to vector<1x16x16xf32>
      %105 = arith.mulf %104, %103 : vector<1x16x16xf32>
      %106 = arith.addf %100, %105 : vector<1x16x16xf32>
      %c15 = arith.constant 15 : index
      %107 = memref.load %arg3[%c15] : memref<98xf32, #tpu.memory_space<smem>>
      %108 = vector.extract_strided_slice %101 {offsets = [0, 0, 1], sizes = [1, 16, 16], strides = [1, 1, 1]} : vector<1x16x22xf32> to vector<1x16x16xf32>
      %109 = vector.broadcast %107 : f32 to vector<1x16x16xf32>
      %110 = arith.mulf %109, %108 : vector<1x16x16xf32>
      %111 = arith.addf %106, %110 : vector<1x16x16xf32>
      %c16 = arith.constant 16 : index
      %112 = memref.load %arg3[%c16] : memref<98xf32, #tpu.memory_space<smem>>
      %113 = vector.extract_strided_slice %101 {offsets = [0, 0, 2], sizes = [1, 16, 16], strides = [1, 1, 1]} : vector<1x16x22xf32> to vector<1x16x16xf32>
      %114 = vector.broadcast %112 : f32 to vector<1x16x16xf32>
      %115 = arith.mulf %114, %113 : vector<1x16x16xf32>
      %116 = arith.addf %111, %115 : vector<1x16x16xf32>
      %c17 = arith.constant 17 : index
      %117 = memref.load %arg3[%c17] : memref<98xf32, #tpu.memory_space<smem>>
      %118 = vector.extract_strided_slice %101 {offsets = [0, 0, 3], sizes = [1, 16, 16], strides = [1, 1, 1]} : vector<1x16x22xf32> to vector<1x16x16xf32>
      %119 = vector.broadcast %117 : f32 to vector<1x16x16xf32>
      %120 = arith.mulf %119, %118 : vector<1x16x16xf32>
      %121 = arith.addf %116, %120 : vector<1x16x16xf32>
      %c18 = arith.constant 18 : index
      %122 = memref.load %arg3[%c18] : memref<98xf32, #tpu.memory_space<smem>>
      %123 = vector.extract_strided_slice %101 {offsets = [0, 0, 4], sizes = [1, 16, 16], strides = [1, 1, 1]} : vector<1x16x22xf32> to vector<1x16x16xf32>
      %124 = vector.broadcast %122 : f32 to vector<1x16x16xf32>
      %125 = arith.mulf %124, %123 : vector<1x16x16xf32>
      %126 = arith.addf %121, %125 : vector<1x16x16xf32>
      %c19_59 = arith.constant 19 : index
      %127 = memref.load %arg3[%c19_59] : memref<98xf32, #tpu.memory_space<smem>>
      %128 = vector.extract_strided_slice %101 {offsets = [0, 0, 5], sizes = [1, 16, 16], strides = [1, 1, 1]} : vector<1x16x22xf32> to vector<1x16x16xf32>
      %129 = vector.broadcast %127 : f32 to vector<1x16x16xf32>
      %130 = arith.mulf %129, %128 : vector<1x16x16xf32>
      %131 = arith.addf %126, %130 : vector<1x16x16xf32>
      %c20 = arith.constant 20 : index
      %132 = memref.load %arg3[%c20] : memref<98xf32, #tpu.memory_space<smem>>
      %133 = vector.extract_strided_slice %101 {offsets = [0, 0, 6], sizes = [1, 16, 16], strides = [1, 1, 1]} : vector<1x16x22xf32> to vector<1x16x16xf32>
      %134 = vector.broadcast %132 : f32 to vector<1x16x16xf32>
      %135 = arith.mulf %134, %133 : vector<1x16x16xf32>
      %136 = arith.addf %131, %135 : vector<1x16x16xf32>
      %c0_60 = arith.constant 0 : index
      %c3_61 = arith.constant 3 : index
      %c0_62 = arith.constant 0 : index
      %137 = vector.load %arg8[%c0_60, %c3_61, %c0_62] : memref<1x22x22xf32, #tpu.memory_space<vmem>>, vector<1x16x22xf32>
      %c21 = arith.constant 21 : index
      %138 = memref.load %arg3[%c21] : memref<98xf32, #tpu.memory_space<smem>>
      %139 = vector.extract_strided_slice %137 {offsets = [0, 0, 0], sizes = [1, 16, 16], strides = [1, 1, 1]} : vector<1x16x22xf32> to vector<1x16x16xf32>
      %140 = vector.broadcast %138 : f32 to vector<1x16x16xf32>
      %141 = arith.mulf %140, %139 : vector<1x16x16xf32>
      %142 = arith.addf %136, %141 : vector<1x16x16xf32>
      %c22 = arith.constant 22 : index
      %143 = memref.load %arg3[%c22] : memref<98xf32, #tpu.memory_space<smem>>
      %144 = vector.extract_strided_slice %137 {offsets = [0, 0, 1], sizes = [1, 16, 16], strides = [1, 1, 1]} : vector<1x16x22xf32> to vector<1x16x16xf32>
      %145 = vector.broadcast %143 : f32 to vector<1x16x16xf32>
      %146 = arith.mulf %145, %144 : vector<1x16x16xf32>
      %147 = arith.addf %142, %146 : vector<1x16x16xf32>
      %c23 = arith.constant 23 : index
      %148 = memref.load %arg3[%c23] : memref<98xf32, #tpu.memory_space<smem>>
      %149 = vector.extract_strided_slice %137 {offsets = [0, 0, 2], sizes = [1, 16, 16], strides = [1, 1, 1]} : vector<1x16x22xf32> to vector<1x16x16xf32>
      %150 = vector.broadcast %148 : f32 to vector<1x16x16xf32>
      %151 = arith.mulf %150, %149 : vector<1x16x16xf32>
      %152 = arith.addf %147, %151 : vector<1x16x16xf32>
      %c24 = arith.constant 24 : index
      %153 = memref.load %arg3[%c24] : memref<98xf32, #tpu.memory_space<smem>>
      %154 = vector.extract_strided_slice %137 {offsets = [0, 0, 3], sizes = [1, 16, 16], strides = [1, 1, 1]} : vector<1x16x22xf32> to vector<1x16x16xf32>
      %155 = vector.broadcast %153 : f32 to vector<1x16x16xf32>
      %156 = arith.mulf %155, %154 : vector<1x16x16xf32>
      %157 = arith.addf %152, %156 : vector<1x16x16xf32>
      %c25 = arith.constant 25 : index
      %158 = memref.load %arg3[%c25] : memref<98xf32, #tpu.memory_space<smem>>
      %159 = vector.extract_strided_slice %137 {offsets = [0, 0, 4], sizes = [1, 16, 16], strides = [1, 1, 1]} : vector<1x16x22xf32> to vector<1x16x16xf32>
      %160 = vector.broadcast %158 : f32 to vector<1x16x16xf32>
      %161 = arith.mulf %160, %159 : vector<1x16x16xf32>
      %162 = arith.addf %157, %161 : vector<1x16x16xf32>
      %c26 = arith.constant 26 : index
      %163 = memref.load %arg3[%c26] : memref<98xf32, #tpu.memory_space<smem>>
      %164 = vector.extract_strided_slice %137 {offsets = [0, 0, 5], sizes = [1, 16, 16], strides = [1, 1, 1]} : vector<1x16x22xf32> to vector<1x16x16xf32>
      %165 = vector.broadcast %163 : f32 to vector<1x16x16xf32>
      %166 = arith.mulf %165, %164 : vector<1x16x16xf32>
      %167 = arith.addf %162, %166 : vector<1x16x16xf32>
      %c27 = arith.constant 27 : index
      %168 = memref.load %arg3[%c27] : memref<98xf32, #tpu.memory_space<smem>>
      %169 = vector.extract_strided_slice %137 {offsets = [0, 0, 6], sizes = [1, 16, 16], strides = [1, 1, 1]} : vector<1x16x22xf32> to vector<1x16x16xf32>
      %170 = vector.broadcast %168 : f32 to vector<1x16x16xf32>
      %171 = arith.mulf %170, %169 : vector<1x16x16xf32>
      %172 = arith.addf %167, %171 : vector<1x16x16xf32>
      %c0_63 = arith.constant 0 : index
      %c4_64 = arith.constant 4 : index
      %c0_65 = arith.constant 0 : index
      %173 = vector.load %arg8[%c0_63, %c4_64, %c0_65] : memref<1x22x22xf32, #tpu.memory_space<vmem>>, vector<1x16x22xf32>
      %c28 = arith.constant 28 : index
      %174 = memref.load %arg3[%c28] : memref<98xf32, #tpu.memory_space<smem>>
      %175 = vector.extract_strided_slice %173 {offsets = [0, 0, 0], sizes = [1, 16, 16], strides = [1, 1, 1]} : vector<1x16x22xf32> to vector<1x16x16xf32>
      %176 = vector.broadcast %174 : f32 to vector<1x16x16xf32>
      %177 = arith.mulf %176, %175 : vector<1x16x16xf32>
      %178 = arith.addf %172, %177 : vector<1x16x16xf32>
      %c29 = arith.constant 29 : index
      %179 = memref.load %arg3[%c29] : memref<98xf32, #tpu.memory_space<smem>>
      %180 = vector.extract_strided_slice %173 {offsets = [0, 0, 1], sizes = [1, 16, 16], strides = [1, 1, 1]} : vector<1x16x22xf32> to vector<1x16x16xf32>
      %181 = vector.broadcast %179 : f32 to vector<1x16x16xf32>
      %182 = arith.mulf %181, %180 : vector<1x16x16xf32>
      %183 = arith.addf %178, %182 : vector<1x16x16xf32>
      %c30 = arith.constant 30 : index
      %184 = memref.load %arg3[%c30] : memref<98xf32, #tpu.memory_space<smem>>
      %185 = vector.extract_strided_slice %173 {offsets = [0, 0, 2], sizes = [1, 16, 16], strides = [1, 1, 1]} : vector<1x16x22xf32> to vector<1x16x16xf32>
      %186 = vector.broadcast %184 : f32 to vector<1x16x16xf32>
      %187 = arith.mulf %186, %185 : vector<1x16x16xf32>
      %188 = arith.addf %183, %187 : vector<1x16x16xf32>
      %c31 = arith.constant 31 : index
      %189 = memref.load %arg3[%c31] : memref<98xf32, #tpu.memory_space<smem>>
      %190 = vector.extract_strided_slice %173 {offsets = [0, 0, 3], sizes = [1, 16, 16], strides = [1, 1, 1]} : vector<1x16x22xf32> to vector<1x16x16xf32>
      %191 = vector.broadcast %189 : f32 to vector<1x16x16xf32>
      %192 = arith.mulf %191, %190 : vector<1x16x16xf32>
      %193 = arith.addf %188, %192 : vector<1x16x16xf32>
      %c32 = arith.constant 32 : index
      %194 = memref.load %arg3[%c32] : memref<98xf32, #tpu.memory_space<smem>>
      %195 = vector.extract_strided_slice %173 {offsets = [0, 0, 4], sizes = [1, 16, 16], strides = [1, 1, 1]} : vector<1x16x22xf32> to vector<1x16x16xf32>
      %196 = vector.broadcast %194 : f32 to vector<1x16x16xf32>
      %197 = arith.mulf %196, %195 : vector<1x16x16xf32>
      %198 = arith.addf %193, %197 : vector<1x16x16xf32>
      %c33 = arith.constant 33 : index
      %199 = memref.load %arg3[%c33] : memref<98xf32, #tpu.memory_space<smem>>
      %200 = vector.extract_strided_slice %173 {offsets = [0, 0, 5], sizes = [1, 16, 16], strides = [1, 1, 1]} : vector<1x16x22xf32> to vector<1x16x16xf32>
      %201 = vector.broadcast %199 : f32 to vector<1x16x16xf32>
      %202 = arith.mulf %201, %200 : vector<1x16x16xf32>
      %203 = arith.addf %198, %202 : vector<1x16x16xf32>
      %c34 = arith.constant 34 : index
      %204 = memref.load %arg3[%c34] : memref<98xf32, #tpu.memory_space<smem>>
      %205 = vector.extract_strided_slice %173 {offsets = [0, 0, 6], sizes = [1, 16, 16], strides = [1, 1, 1]} : vector<1x16x22xf32> to vector<1x16x16xf32>
      %206 = vector.broadcast %204 : f32 to vector<1x16x16xf32>
      %207 = arith.mulf %206, %205 : vector<1x16x16xf32>
      %208 = arith.addf %203, %207 : vector<1x16x16xf32>
      %c0_66 = arith.constant 0 : index
      %c5_67 = arith.constant 5 : index
      %c0_68 = arith.constant 0 : index
      %209 = vector.load %arg8[%c0_66, %c5_67, %c0_68] : memref<1x22x22xf32, #tpu.memory_space<vmem>>, vector<1x16x22xf32>
      %c35 = arith.constant 35 : index
      %210 = memref.load %arg3[%c35] : memref<98xf32, #tpu.memory_space<smem>>
      %211 = vector.extract_strided_slice %209 {offsets = [0, 0, 0], sizes = [1, 16, 16], strides = [1, 1, 1]} : vector<1x16x22xf32> to vector<1x16x16xf32>
      %212 = vector.broadcast %210 : f32 to vector<1x16x16xf32>
      %213 = arith.mulf %212, %211 : vector<1x16x16xf32>
      %214 = arith.addf %208, %213 : vector<1x16x16xf32>
      %c36 = arith.constant 36 : index
      %215 = memref.load %arg3[%c36] : memref<98xf32, #tpu.memory_space<smem>>
      %216 = vector.extract_strided_slice %209 {offsets = [0, 0, 1], sizes = [1, 16, 16], strides = [1, 1, 1]} : vector<1x16x22xf32> to vector<1x16x16xf32>
      %217 = vector.broadcast %215 : f32 to vector<1x16x16xf32>
      %218 = arith.mulf %217, %216 : vector<1x16x16xf32>
      %219 = arith.addf %214, %218 : vector<1x16x16xf32>
      %c37 = arith.constant 37 : index
      %220 = memref.load %arg3[%c37] : memref<98xf32, #tpu.memory_space<smem>>
      %221 = vector.extract_strided_slice %209 {offsets = [0, 0, 2], sizes = [1, 16, 16], strides = [1, 1, 1]} : vector<1x16x22xf32> to vector<1x16x16xf32>
      %222 = vector.broadcast %220 : f32 to vector<1x16x16xf32>
      %223 = arith.mulf %222, %221 : vector<1x16x16xf32>
      %224 = arith.addf %219, %223 : vector<1x16x16xf32>
      %c38 = arith.constant 38 : index
      %225 = memref.load %arg3[%c38] : memref<98xf32, #tpu.memory_space<smem>>
      %226 = vector.extract_strided_slice %209 {offsets = [0, 0, 3], sizes = [1, 16, 16], strides = [1, 1, 1]} : vector<1x16x22xf32> to vector<1x16x16xf32>
      %227 = vector.broadcast %225 : f32 to vector<1x16x16xf32>
      %228 = arith.mulf %227, %226 : vector<1x16x16xf32>
      %229 = arith.addf %224, %228 : vector<1x16x16xf32>
      %c39 = arith.constant 39 : index
      %230 = memref.load %arg3[%c39] : memref<98xf32, #tpu.memory_space<smem>>
      %231 = vector.extract_strided_slice %209 {offsets = [0, 0, 4], sizes = [1, 16, 16], strides = [1, 1, 1]} : vector<1x16x22xf32> to vector<1x16x16xf32>
      %232 = vector.broadcast %230 : f32 to vector<1x16x16xf32>
      %233 = arith.mulf %232, %231 : vector<1x16x16xf32>
      %234 = arith.addf %229, %233 : vector<1x16x16xf32>
      %c40 = arith.constant 40 : index
      %235 = memref.load %arg3[%c40] : memref<98xf32, #tpu.memory_space<smem>>
      %236 = vector.extract_strided_slice %209 {offsets = [0, 0, 5], sizes = [1, 16, 16], strides = [1, 1, 1]} : vector<1x16x22xf32> to vector<1x16x16xf32>
      %237 = vector.broadcast %235 : f32 to vector<1x16x16xf32>
      %238 = arith.mulf %237, %236 : vector<1x16x16xf32>
      %239 = arith.addf %234, %238 : vector<1x16x16xf32>
      %c41 = arith.constant 41 : index
      %240 = memref.load %arg3[%c41] : memref<98xf32, #tpu.memory_space<smem>>
      %241 = vector.extract_strided_slice %209 {offsets = [0, 0, 6], sizes = [1, 16, 16], strides = [1, 1, 1]} : vector<1x16x22xf32> to vector<1x16x16xf32>
      %242 = vector.broadcast %240 : f32 to vector<1x16x16xf32>
      %243 = arith.mulf %242, %241 : vector<1x16x16xf32>
      %244 = arith.addf %239, %243 : vector<1x16x16xf32>
      %c0_69 = arith.constant 0 : index
      %c6_70 = arith.constant 6 : index
      %c0_71 = arith.constant 0 : index
      %245 = vector.load %arg8[%c0_69, %c6_70, %c0_71] : memref<1x22x22xf32, #tpu.memory_space<vmem>>, vector<1x16x22xf32>
      %c42 = arith.constant 42 : index
      %246 = memref.load %arg3[%c42] : memref<98xf32, #tpu.memory_space<smem>>
      %247 = vector.extract_strided_slice %245 {offsets = [0, 0, 0], sizes = [1, 16, 16], strides = [1, 1, 1]} : vector<1x16x22xf32> to vector<1x16x16xf32>
      %248 = vector.broadcast %246 : f32 to vector<1x16x16xf32>
      %249 = arith.mulf %248, %247 : vector<1x16x16xf32>
      %250 = arith.addf %244, %249 : vector<1x16x16xf32>
      %c43 = arith.constant 43 : index
      %251 = memref.load %arg3[%c43] : memref<98xf32, #tpu.memory_space<smem>>
      %252 = vector.extract_strided_slice %245 {offsets = [0, 0, 1], sizes = [1, 16, 16], strides = [1, 1, 1]} : vector<1x16x22xf32> to vector<1x16x16xf32>
      %253 = vector.broadcast %251 : f32 to vector<1x16x16xf32>
      %254 = arith.mulf %253, %252 : vector<1x16x16xf32>
      %255 = arith.addf %250, %254 : vector<1x16x16xf32>
      %c44 = arith.constant 44 : index
      %256 = memref.load %arg3[%c44] : memref<98xf32, #tpu.memory_space<smem>>
      %257 = vector.extract_strided_slice %245 {offsets = [0, 0, 2], sizes = [1, 16, 16], strides = [1, 1, 1]} : vector<1x16x22xf32> to vector<1x16x16xf32>
      %258 = vector.broadcast %256 : f32 to vector<1x16x16xf32>
      %259 = arith.mulf %258, %257 : vector<1x16x16xf32>
      %260 = arith.addf %255, %259 : vector<1x16x16xf32>
      %c45 = arith.constant 45 : index
      %261 = memref.load %arg3[%c45] : memref<98xf32, #tpu.memory_space<smem>>
      %262 = vector.extract_strided_slice %245 {offsets = [0, 0, 3], sizes = [1, 16, 16], strides = [1, 1, 1]} : vector<1x16x22xf32> to vector<1x16x16xf32>
      %263 = vector.broadcast %261 : f32 to vector<1x16x16xf32>
      %264 = arith.mulf %263, %262 : vector<1x16x16xf32>
      %265 = arith.addf %260, %264 : vector<1x16x16xf32>
      %c46 = arith.constant 46 : index
      %266 = memref.load %arg3[%c46] : memref<98xf32, #tpu.memory_space<smem>>
      %267 = vector.extract_strided_slice %245 {offsets = [0, 0, 4], sizes = [1, 16, 16], strides = [1, 1, 1]} : vector<1x16x22xf32> to vector<1x16x16xf32>
      %268 = vector.broadcast %266 : f32 to vector<1x16x16xf32>
      %269 = arith.mulf %268, %267 : vector<1x16x16xf32>
      %270 = arith.addf %265, %269 : vector<1x16x16xf32>
      %c47 = arith.constant 47 : index
      %271 = memref.load %arg3[%c47] : memref<98xf32, #tpu.memory_space<smem>>
      %272 = vector.extract_strided_slice %245 {offsets = [0, 0, 5], sizes = [1, 16, 16], strides = [1, 1, 1]} : vector<1x16x22xf32> to vector<1x16x16xf32>
      %273 = vector.broadcast %271 : f32 to vector<1x16x16xf32>
      %274 = arith.mulf %273, %272 : vector<1x16x16xf32>
      %275 = arith.addf %270, %274 : vector<1x16x16xf32>
      %c48 = arith.constant 48 : index
      %276 = memref.load %arg3[%c48] : memref<98xf32, #tpu.memory_space<smem>>
      %277 = vector.extract_strided_slice %245 {offsets = [0, 0, 6], sizes = [1, 16, 16], strides = [1, 1, 1]} : vector<1x16x22xf32> to vector<1x16x16xf32>
      %278 = vector.broadcast %276 : f32 to vector<1x16x16xf32>
      %279 = arith.mulf %278, %277 : vector<1x16x16xf32>
      %280 = arith.addf %275, %279 : vector<1x16x16xf32>
      %cst_72 = arith.constant 0.000000e+00 : f32
      %281 = vector.broadcast %cst_72 : f32 to vector<1x16x16xf32>
      %c0_73 = arith.constant 0 : index
      %c0_74 = arith.constant 0 : index
      %c0_75 = arith.constant 0 : index
      %282 = vector.load %arg9[%c0_73, %c0_74, %c0_75] : memref<1x22x22xf32, #tpu.memory_space<vmem>>, vector<1x16x22xf32>
      %c49 = arith.constant 49 : index
      %283 = memref.load %arg3[%c49] : memref<98xf32, #tpu.memory_space<smem>>
      %284 = vector.extract_strided_slice %282 {offsets = [0, 0, 0], sizes = [1, 16, 16], strides = [1, 1, 1]} : vector<1x16x22xf32> to vector<1x16x16xf32>
      %285 = vector.broadcast %283 : f32 to vector<1x16x16xf32>
      %286 = arith.mulf %285, %284 : vector<1x16x16xf32>
      %287 = arith.addf %281, %286 : vector<1x16x16xf32>
      %c50 = arith.constant 50 : index
      %288 = memref.load %arg3[%c50] : memref<98xf32, #tpu.memory_space<smem>>
      %289 = vector.extract_strided_slice %282 {offsets = [0, 0, 1], sizes = [1, 16, 16], strides = [1, 1, 1]} : vector<1x16x22xf32> to vector<1x16x16xf32>
      %290 = vector.broadcast %288 : f32 to vector<1x16x16xf32>
      %291 = arith.mulf %290, %289 : vector<1x16x16xf32>
      %292 = arith.addf %287, %291 : vector<1x16x16xf32>
      %c51 = arith.constant 51 : index
      %293 = memref.load %arg3[%c51] : memref<98xf32, #tpu.memory_space<smem>>
      %294 = vector.extract_strided_slice %282 {offsets = [0, 0, 2], sizes = [1, 16, 16], strides = [1, 1, 1]} : vector<1x16x22xf32> to vector<1x16x16xf32>
      %295 = vector.broadcast %293 : f32 to vector<1x16x16xf32>
      %296 = arith.mulf %295, %294 : vector<1x16x16xf32>
      %297 = arith.addf %292, %296 : vector<1x16x16xf32>
      %c52 = arith.constant 52 : index
      %298 = memref.load %arg3[%c52] : memref<98xf32, #tpu.memory_space<smem>>
      %299 = vector.extract_strided_slice %282 {offsets = [0, 0, 3], sizes = [1, 16, 16], strides = [1, 1, 1]} : vector<1x16x22xf32> to vector<1x16x16xf32>
      %300 = vector.broadcast %298 : f32 to vector<1x16x16xf32>
      %301 = arith.mulf %300, %299 : vector<1x16x16xf32>
      %302 = arith.addf %297, %301 : vector<1x16x16xf32>
      %c53 = arith.constant 53 : index
      %303 = memref.load %arg3[%c53] : memref<98xf32, #tpu.memory_space<smem>>
      %304 = vector.extract_strided_slice %282 {offsets = [0, 0, 4], sizes = [1, 16, 16], strides = [1, 1, 1]} : vector<1x16x22xf32> to vector<1x16x16xf32>
      %305 = vector.broadcast %303 : f32 to vector<1x16x16xf32>
      %306 = arith.mulf %305, %304 : vector<1x16x16xf32>
      %307 = arith.addf %302, %306 : vector<1x16x16xf32>
      %c54 = arith.constant 54 : index
      %308 = memref.load %arg3[%c54] : memref<98xf32, #tpu.memory_space<smem>>
      %309 = vector.extract_strided_slice %282 {offsets = [0, 0, 5], sizes = [1, 16, 16], strides = [1, 1, 1]} : vector<1x16x22xf32> to vector<1x16x16xf32>
      %310 = vector.broadcast %308 : f32 to vector<1x16x16xf32>
      %311 = arith.mulf %310, %309 : vector<1x16x16xf32>
      %312 = arith.addf %307, %311 : vector<1x16x16xf32>
      %c55 = arith.constant 55 : index
      %313 = memref.load %arg3[%c55] : memref<98xf32, #tpu.memory_space<smem>>
      %314 = vector.extract_strided_slice %282 {offsets = [0, 0, 6], sizes = [1, 16, 16], strides = [1, 1, 1]} : vector<1x16x22xf32> to vector<1x16x16xf32>
      %315 = vector.broadcast %313 : f32 to vector<1x16x16xf32>
      %316 = arith.mulf %315, %314 : vector<1x16x16xf32>
      %317 = arith.addf %312, %316 : vector<1x16x16xf32>
      %c0_76 = arith.constant 0 : index
      %c1_77 = arith.constant 1 : index
      %c0_78 = arith.constant 0 : index
      %318 = vector.load %arg9[%c0_76, %c1_77, %c0_78] : memref<1x22x22xf32, #tpu.memory_space<vmem>>, vector<1x16x22xf32>
      %c56 = arith.constant 56 : index
      %319 = memref.load %arg3[%c56] : memref<98xf32, #tpu.memory_space<smem>>
      %320 = vector.extract_strided_slice %318 {offsets = [0, 0, 0], sizes = [1, 16, 16], strides = [1, 1, 1]} : vector<1x16x22xf32> to vector<1x16x16xf32>
      %321 = vector.broadcast %319 : f32 to vector<1x16x16xf32>
      %322 = arith.mulf %321, %320 : vector<1x16x16xf32>
      %323 = arith.addf %317, %322 : vector<1x16x16xf32>
      %c57 = arith.constant 57 : index
      %324 = memref.load %arg3[%c57] : memref<98xf32, #tpu.memory_space<smem>>
      %325 = vector.extract_strided_slice %318 {offsets = [0, 0, 1], sizes = [1, 16, 16], strides = [1, 1, 1]} : vector<1x16x22xf32> to vector<1x16x16xf32>
      %326 = vector.broadcast %324 : f32 to vector<1x16x16xf32>
      %327 = arith.mulf %326, %325 : vector<1x16x16xf32>
      %328 = arith.addf %323, %327 : vector<1x16x16xf32>
      %c58 = arith.constant 58 : index
      %329 = memref.load %arg3[%c58] : memref<98xf32, #tpu.memory_space<smem>>
      %330 = vector.extract_strided_slice %318 {offsets = [0, 0, 2], sizes = [1, 16, 16], strides = [1, 1, 1]} : vector<1x16x22xf32> to vector<1x16x16xf32>
      %331 = vector.broadcast %329 : f32 to vector<1x16x16xf32>
      %332 = arith.mulf %331, %330 : vector<1x16x16xf32>
      %333 = arith.addf %328, %332 : vector<1x16x16xf32>
      %c59 = arith.constant 59 : index
      %334 = memref.load %arg3[%c59] : memref<98xf32, #tpu.memory_space<smem>>
      %335 = vector.extract_strided_slice %318 {offsets = [0, 0, 3], sizes = [1, 16, 16], strides = [1, 1, 1]} : vector<1x16x22xf32> to vector<1x16x16xf32>
      %336 = vector.broadcast %334 : f32 to vector<1x16x16xf32>
      %337 = arith.mulf %336, %335 : vector<1x16x16xf32>
      %338 = arith.addf %333, %337 : vector<1x16x16xf32>
      %c60 = arith.constant 60 : index
      %339 = memref.load %arg3[%c60] : memref<98xf32, #tpu.memory_space<smem>>
      %340 = vector.extract_strided_slice %318 {offsets = [0, 0, 4], sizes = [1, 16, 16], strides = [1, 1, 1]} : vector<1x16x22xf32> to vector<1x16x16xf32>
      %341 = vector.broadcast %339 : f32 to vector<1x16x16xf32>
      %342 = arith.mulf %341, %340 : vector<1x16x16xf32>
      %343 = arith.addf %338, %342 : vector<1x16x16xf32>
      %c61 = arith.constant 61 : index
      %344 = memref.load %arg3[%c61] : memref<98xf32, #tpu.memory_space<smem>>
      %345 = vector.extract_strided_slice %318 {offsets = [0, 0, 5], sizes = [1, 16, 16], strides = [1, 1, 1]} : vector<1x16x22xf32> to vector<1x16x16xf32>
      %346 = vector.broadcast %344 : f32 to vector<1x16x16xf32>
      %347 = arith.mulf %346, %345 : vector<1x16x16xf32>
      %348 = arith.addf %343, %347 : vector<1x16x16xf32>
      %c62 = arith.constant 62 : index
      %349 = memref.load %arg3[%c62] : memref<98xf32, #tpu.memory_space<smem>>
      %350 = vector.extract_strided_slice %318 {offsets = [0, 0, 6], sizes = [1, 16, 16], strides = [1, 1, 1]} : vector<1x16x22xf32> to vector<1x16x16xf32>
      %351 = vector.broadcast %349 : f32 to vector<1x16x16xf32>
      %352 = arith.mulf %351, %350 : vector<1x16x16xf32>
      %353 = arith.addf %348, %352 : vector<1x16x16xf32>
      %c0_79 = arith.constant 0 : index
      %c2_80 = arith.constant 2 : index
      %c0_81 = arith.constant 0 : index
      %354 = vector.load %arg9[%c0_79, %c2_80, %c0_81] : memref<1x22x22xf32, #tpu.memory_space<vmem>>, vector<1x16x22xf32>
      %c63 = arith.constant 63 : index
      %355 = memref.load %arg3[%c63] : memref<98xf32, #tpu.memory_space<smem>>
      %356 = vector.extract_strided_slice %354 {offsets = [0, 0, 0], sizes = [1, 16, 16], strides = [1, 1, 1]} : vector<1x16x22xf32> to vector<1x16x16xf32>
      %357 = vector.broadcast %355 : f32 to vector<1x16x16xf32>
      %358 = arith.mulf %357, %356 : vector<1x16x16xf32>
      %359 = arith.addf %353, %358 : vector<1x16x16xf32>
      %c64 = arith.constant 64 : index
      %360 = memref.load %arg3[%c64] : memref<98xf32, #tpu.memory_space<smem>>
      %361 = vector.extract_strided_slice %354 {offsets = [0, 0, 1], sizes = [1, 16, 16], strides = [1, 1, 1]} : vector<1x16x22xf32> to vector<1x16x16xf32>
      %362 = vector.broadcast %360 : f32 to vector<1x16x16xf32>
      %363 = arith.mulf %362, %361 : vector<1x16x16xf32>
      %364 = arith.addf %359, %363 : vector<1x16x16xf32>
      %c65 = arith.constant 65 : index
      %365 = memref.load %arg3[%c65] : memref<98xf32, #tpu.memory_space<smem>>
      %366 = vector.extract_strided_slice %354 {offsets = [0, 0, 2], sizes = [1, 16, 16], strides = [1, 1, 1]} : vector<1x16x22xf32> to vector<1x16x16xf32>
      %367 = vector.broadcast %365 : f32 to vector<1x16x16xf32>
      %368 = arith.mulf %367, %366 : vector<1x16x16xf32>
      %369 = arith.addf %364, %368 : vector<1x16x16xf32>
      %c66 = arith.constant 66 : index
      %370 = memref.load %arg3[%c66] : memref<98xf32, #tpu.memory_space<smem>>
      %371 = vector.extract_strided_slice %354 {offsets = [0, 0, 3], sizes = [1, 16, 16], strides = [1, 1, 1]} : vector<1x16x22xf32> to vector<1x16x16xf32>
      %372 = vector.broadcast %370 : f32 to vector<1x16x16xf32>
      %373 = arith.mulf %372, %371 : vector<1x16x16xf32>
      %374 = arith.addf %369, %373 : vector<1x16x16xf32>
      %c67 = arith.constant 67 : index
      %375 = memref.load %arg3[%c67] : memref<98xf32, #tpu.memory_space<smem>>
      %376 = vector.extract_strided_slice %354 {offsets = [0, 0, 4], sizes = [1, 16, 16], strides = [1, 1, 1]} : vector<1x16x22xf32> to vector<1x16x16xf32>
      %377 = vector.broadcast %375 : f32 to vector<1x16x16xf32>
      %378 = arith.mulf %377, %376 : vector<1x16x16xf32>
      %379 = arith.addf %374, %378 : vector<1x16x16xf32>
      %c68 = arith.constant 68 : index
      %380 = memref.load %arg3[%c68] : memref<98xf32, #tpu.memory_space<smem>>
      %381 = vector.extract_strided_slice %354 {offsets = [0, 0, 5], sizes = [1, 16, 16], strides = [1, 1, 1]} : vector<1x16x22xf32> to vector<1x16x16xf32>
      %382 = vector.broadcast %380 : f32 to vector<1x16x16xf32>
      %383 = arith.mulf %382, %381 : vector<1x16x16xf32>
      %384 = arith.addf %379, %383 : vector<1x16x16xf32>
      %c69 = arith.constant 69 : index
      %385 = memref.load %arg3[%c69] : memref<98xf32, #tpu.memory_space<smem>>
      %386 = vector.extract_strided_slice %354 {offsets = [0, 0, 6], sizes = [1, 16, 16], strides = [1, 1, 1]} : vector<1x16x22xf32> to vector<1x16x16xf32>
      %387 = vector.broadcast %385 : f32 to vector<1x16x16xf32>
      %388 = arith.mulf %387, %386 : vector<1x16x16xf32>
      %389 = arith.addf %384, %388 : vector<1x16x16xf32>
      %c0_82 = arith.constant 0 : index
      %c3_83 = arith.constant 3 : index
      %c0_84 = arith.constant 0 : index
      %390 = vector.load %arg9[%c0_82, %c3_83, %c0_84] : memref<1x22x22xf32, #tpu.memory_space<vmem>>, vector<1x16x22xf32>
      %c70 = arith.constant 70 : index
      %391 = memref.load %arg3[%c70] : memref<98xf32, #tpu.memory_space<smem>>
      %392 = vector.extract_strided_slice %390 {offsets = [0, 0, 0], sizes = [1, 16, 16], strides = [1, 1, 1]} : vector<1x16x22xf32> to vector<1x16x16xf32>
      %393 = vector.broadcast %391 : f32 to vector<1x16x16xf32>
      %394 = arith.mulf %393, %392 : vector<1x16x16xf32>
      %395 = arith.addf %389, %394 : vector<1x16x16xf32>
      %c71 = arith.constant 71 : index
      %396 = memref.load %arg3[%c71] : memref<98xf32, #tpu.memory_space<smem>>
      %397 = vector.extract_strided_slice %390 {offsets = [0, 0, 1], sizes = [1, 16, 16], strides = [1, 1, 1]} : vector<1x16x22xf32> to vector<1x16x16xf32>
      %398 = vector.broadcast %396 : f32 to vector<1x16x16xf32>
      %399 = arith.mulf %398, %397 : vector<1x16x16xf32>
      %400 = arith.addf %395, %399 : vector<1x16x16xf32>
      %c72 = arith.constant 72 : index
      %401 = memref.load %arg3[%c72] : memref<98xf32, #tpu.memory_space<smem>>
      %402 = vector.extract_strided_slice %390 {offsets = [0, 0, 2], sizes = [1, 16, 16], strides = [1, 1, 1]} : vector<1x16x22xf32> to vector<1x16x16xf32>
      %403 = vector.broadcast %401 : f32 to vector<1x16x16xf32>
      %404 = arith.mulf %403, %402 : vector<1x16x16xf32>
      %405 = arith.addf %400, %404 : vector<1x16x16xf32>
      %c73 = arith.constant 73 : index
      %406 = memref.load %arg3[%c73] : memref<98xf32, #tpu.memory_space<smem>>
      %407 = vector.extract_strided_slice %390 {offsets = [0, 0, 3], sizes = [1, 16, 16], strides = [1, 1, 1]} : vector<1x16x22xf32> to vector<1x16x16xf32>
      %408 = vector.broadcast %406 : f32 to vector<1x16x16xf32>
      %409 = arith.mulf %408, %407 : vector<1x16x16xf32>
      %410 = arith.addf %405, %409 : vector<1x16x16xf32>
      %c74 = arith.constant 74 : index
      %411 = memref.load %arg3[%c74] : memref<98xf32, #tpu.memory_space<smem>>
      %412 = vector.extract_strided_slice %390 {offsets = [0, 0, 4], sizes = [1, 16, 16], strides = [1, 1, 1]} : vector<1x16x22xf32> to vector<1x16x16xf32>
      %413 = vector.broadcast %411 : f32 to vector<1x16x16xf32>
      %414 = arith.mulf %413, %412 : vector<1x16x16xf32>
      %415 = arith.addf %410, %414 : vector<1x16x16xf32>
      %c75 = arith.constant 75 : index
      %416 = memref.load %arg3[%c75] : memref<98xf32, #tpu.memory_space<smem>>
      %417 = vector.extract_strided_slice %390 {offsets = [0, 0, 5], sizes = [1, 16, 16], strides = [1, 1, 1]} : vector<1x16x22xf32> to vector<1x16x16xf32>
      %418 = vector.broadcast %416 : f32 to vector<1x16x16xf32>
      %419 = arith.mulf %418, %417 : vector<1x16x16xf32>
      %420 = arith.addf %415, %419 : vector<1x16x16xf32>
      %c76 = arith.constant 76 : index
      %421 = memref.load %arg3[%c76] : memref<98xf32, #tpu.memory_space<smem>>
      %422 = vector.extract_strided_slice %390 {offsets = [0, 0, 6], sizes = [1, 16, 16], strides = [1, 1, 1]} : vector<1x16x22xf32> to vector<1x16x16xf32>
      %423 = vector.broadcast %421 : f32 to vector<1x16x16xf32>
      %424 = arith.mulf %423, %422 : vector<1x16x16xf32>
      %425 = arith.addf %420, %424 : vector<1x16x16xf32>
      %c0_85 = arith.constant 0 : index
      %c4_86 = arith.constant 4 : index
      %c0_87 = arith.constant 0 : index
      %426 = vector.load %arg9[%c0_85, %c4_86, %c0_87] : memref<1x22x22xf32, #tpu.memory_space<vmem>>, vector<1x16x22xf32>
      %c77 = arith.constant 77 : index
      %427 = memref.load %arg3[%c77] : memref<98xf32, #tpu.memory_space<smem>>
      %428 = vector.extract_strided_slice %426 {offsets = [0, 0, 0], sizes = [1, 16, 16], strides = [1, 1, 1]} : vector<1x16x22xf32> to vector<1x16x16xf32>
      %429 = vector.broadcast %427 : f32 to vector<1x16x16xf32>
      %430 = arith.mulf %429, %428 : vector<1x16x16xf32>
      %431 = arith.addf %425, %430 : vector<1x16x16xf32>
      %c78 = arith.constant 78 : index
      %432 = memref.load %arg3[%c78] : memref<98xf32, #tpu.memory_space<smem>>
      %433 = vector.extract_strided_slice %426 {offsets = [0, 0, 1], sizes = [1, 16, 16], strides = [1, 1, 1]} : vector<1x16x22xf32> to vector<1x16x16xf32>
      %434 = vector.broadcast %432 : f32 to vector<1x16x16xf32>
      %435 = arith.mulf %434, %433 : vector<1x16x16xf32>
      %436 = arith.addf %431, %435 : vector<1x16x16xf32>
      %c79 = arith.constant 79 : index
      %437 = memref.load %arg3[%c79] : memref<98xf32, #tpu.memory_space<smem>>
      %438 = vector.extract_strided_slice %426 {offsets = [0, 0, 2], sizes = [1, 16, 16], strides = [1, 1, 1]} : vector<1x16x22xf32> to vector<1x16x16xf32>
      %439 = vector.broadcast %437 : f32 to vector<1x16x16xf32>
      %440 = arith.mulf %439, %438 : vector<1x16x16xf32>
      %441 = arith.addf %436, %440 : vector<1x16x16xf32>
      %c80 = arith.constant 80 : index
      %442 = memref.load %arg3[%c80] : memref<98xf32, #tpu.memory_space<smem>>
      %443 = vector.extract_strided_slice %426 {offsets = [0, 0, 3], sizes = [1, 16, 16], strides = [1, 1, 1]} : vector<1x16x22xf32> to vector<1x16x16xf32>
      %444 = vector.broadcast %442 : f32 to vector<1x16x16xf32>
      %445 = arith.mulf %444, %443 : vector<1x16x16xf32>
      %446 = arith.addf %441, %445 : vector<1x16x16xf32>
      %c81 = arith.constant 81 : index
      %447 = memref.load %arg3[%c81] : memref<98xf32, #tpu.memory_space<smem>>
      %448 = vector.extract_strided_slice %426 {offsets = [0, 0, 4], sizes = [1, 16, 16], strides = [1, 1, 1]} : vector<1x16x22xf32> to vector<1x16x16xf32>
      %449 = vector.broadcast %447 : f32 to vector<1x16x16xf32>
      %450 = arith.mulf %449, %448 : vector<1x16x16xf32>
      %451 = arith.addf %446, %450 : vector<1x16x16xf32>
      %c82 = arith.constant 82 : index
      %452 = memref.load %arg3[%c82] : memref<98xf32, #tpu.memory_space<smem>>
      %453 = vector.extract_strided_slice %426 {offsets = [0, 0, 5], sizes = [1, 16, 16], strides = [1, 1, 1]} : vector<1x16x22xf32> to vector<1x16x16xf32>
      %454 = vector.broadcast %452 : f32 to vector<1x16x16xf32>
      %455 = arith.mulf %454, %453 : vector<1x16x16xf32>
      %456 = arith.addf %451, %455 : vector<1x16x16xf32>
      %c83 = arith.constant 83 : index
      %457 = memref.load %arg3[%c83] : memref<98xf32, #tpu.memory_space<smem>>
      %458 = vector.extract_strided_slice %426 {offsets = [0, 0, 6], sizes = [1, 16, 16], strides = [1, 1, 1]} : vector<1x16x22xf32> to vector<1x16x16xf32>
      %459 = vector.broadcast %457 : f32 to vector<1x16x16xf32>
      %460 = arith.mulf %459, %458 : vector<1x16x16xf32>
      %461 = arith.addf %456, %460 : vector<1x16x16xf32>
      %c0_88 = arith.constant 0 : index
      %c5_89 = arith.constant 5 : index
      %c0_90 = arith.constant 0 : index
      %462 = vector.load %arg9[%c0_88, %c5_89, %c0_90] : memref<1x22x22xf32, #tpu.memory_space<vmem>>, vector<1x16x22xf32>
      %c84 = arith.constant 84 : index
      %463 = memref.load %arg3[%c84] : memref<98xf32, #tpu.memory_space<smem>>
      %464 = vector.extract_strided_slice %462 {offsets = [0, 0, 0], sizes = [1, 16, 16], strides = [1, 1, 1]} : vector<1x16x22xf32> to vector<1x16x16xf32>
      %465 = vector.broadcast %463 : f32 to vector<1x16x16xf32>
      %466 = arith.mulf %465, %464 : vector<1x16x16xf32>
      %467 = arith.addf %461, %466 : vector<1x16x16xf32>
      %c85 = arith.constant 85 : index
      %468 = memref.load %arg3[%c85] : memref<98xf32, #tpu.memory_space<smem>>
      %469 = vector.extract_strided_slice %462 {offsets = [0, 0, 1], sizes = [1, 16, 16], strides = [1, 1, 1]} : vector<1x16x22xf32> to vector<1x16x16xf32>
      %470 = vector.broadcast %468 : f32 to vector<1x16x16xf32>
      %471 = arith.mulf %470, %469 : vector<1x16x16xf32>
      %472 = arith.addf %467, %471 : vector<1x16x16xf32>
      %c86 = arith.constant 86 : index
      %473 = memref.load %arg3[%c86] : memref<98xf32, #tpu.memory_space<smem>>
      %474 = vector.extract_strided_slice %462 {offsets = [0, 0, 2], sizes = [1, 16, 16], strides = [1, 1, 1]} : vector<1x16x22xf32> to vector<1x16x16xf32>
      %475 = vector.broadcast %473 : f32 to vector<1x16x16xf32>
      %476 = arith.mulf %475, %474 : vector<1x16x16xf32>
      %477 = arith.addf %472, %476 : vector<1x16x16xf32>
      %c87 = arith.constant 87 : index
      %478 = memref.load %arg3[%c87] : memref<98xf32, #tpu.memory_space<smem>>
      %479 = vector.extract_strided_slice %462 {offsets = [0, 0, 3], sizes = [1, 16, 16], strides = [1, 1, 1]} : vector<1x16x22xf32> to vector<1x16x16xf32>
      %480 = vector.broadcast %478 : f32 to vector<1x16x16xf32>
      %481 = arith.mulf %480, %479 : vector<1x16x16xf32>
      %482 = arith.addf %477, %481 : vector<1x16x16xf32>
      %c88 = arith.constant 88 : index
      %483 = memref.load %arg3[%c88] : memref<98xf32, #tpu.memory_space<smem>>
      %484 = vector.extract_strided_slice %462 {offsets = [0, 0, 4], sizes = [1, 16, 16], strides = [1, 1, 1]} : vector<1x16x22xf32> to vector<1x16x16xf32>
      %485 = vector.broadcast %483 : f32 to vector<1x16x16xf32>
      %486 = arith.mulf %485, %484 : vector<1x16x16xf32>
      %487 = arith.addf %482, %486 : vector<1x16x16xf32>
      %c89 = arith.constant 89 : index
      %488 = memref.load %arg3[%c89] : memref<98xf32, #tpu.memory_space<smem>>
      %489 = vector.extract_strided_slice %462 {offsets = [0, 0, 5], sizes = [1, 16, 16], strides = [1, 1, 1]} : vector<1x16x22xf32> to vector<1x16x16xf32>
      %490 = vector.broadcast %488 : f32 to vector<1x16x16xf32>
      %491 = arith.mulf %490, %489 : vector<1x16x16xf32>
      %492 = arith.addf %487, %491 : vector<1x16x16xf32>
      %c90 = arith.constant 90 : index
      %493 = memref.load %arg3[%c90] : memref<98xf32, #tpu.memory_space<smem>>
      %494 = vector.extract_strided_slice %462 {offsets = [0, 0, 6], sizes = [1, 16, 16], strides = [1, 1, 1]} : vector<1x16x22xf32> to vector<1x16x16xf32>
      %495 = vector.broadcast %493 : f32 to vector<1x16x16xf32>
      %496 = arith.mulf %495, %494 : vector<1x16x16xf32>
      %497 = arith.addf %492, %496 : vector<1x16x16xf32>
      %c0_91 = arith.constant 0 : index
      %c6_92 = arith.constant 6 : index
      %c0_93 = arith.constant 0 : index
      %498 = vector.load %arg9[%c0_91, %c6_92, %c0_93] : memref<1x22x22xf32, #tpu.memory_space<vmem>>, vector<1x16x22xf32>
      %c91 = arith.constant 91 : index
      %499 = memref.load %arg3[%c91] : memref<98xf32, #tpu.memory_space<smem>>
      %500 = vector.extract_strided_slice %498 {offsets = [0, 0, 0], sizes = [1, 16, 16], strides = [1, 1, 1]} : vector<1x16x22xf32> to vector<1x16x16xf32>
      %501 = vector.broadcast %499 : f32 to vector<1x16x16xf32>
      %502 = arith.mulf %501, %500 : vector<1x16x16xf32>
      %503 = arith.addf %497, %502 : vector<1x16x16xf32>
      %c92 = arith.constant 92 : index
      %504 = memref.load %arg3[%c92] : memref<98xf32, #tpu.memory_space<smem>>
      %505 = vector.extract_strided_slice %498 {offsets = [0, 0, 1], sizes = [1, 16, 16], strides = [1, 1, 1]} : vector<1x16x22xf32> to vector<1x16x16xf32>
      %506 = vector.broadcast %504 : f32 to vector<1x16x16xf32>
      %507 = arith.mulf %506, %505 : vector<1x16x16xf32>
      %508 = arith.addf %503, %507 : vector<1x16x16xf32>
      %c93 = arith.constant 93 : index
      %509 = memref.load %arg3[%c93] : memref<98xf32, #tpu.memory_space<smem>>
      %510 = vector.extract_strided_slice %498 {offsets = [0, 0, 2], sizes = [1, 16, 16], strides = [1, 1, 1]} : vector<1x16x22xf32> to vector<1x16x16xf32>
      %511 = vector.broadcast %509 : f32 to vector<1x16x16xf32>
      %512 = arith.mulf %511, %510 : vector<1x16x16xf32>
      %513 = arith.addf %508, %512 : vector<1x16x16xf32>
      %c94 = arith.constant 94 : index
      %514 = memref.load %arg3[%c94] : memref<98xf32, #tpu.memory_space<smem>>
      %515 = vector.extract_strided_slice %498 {offsets = [0, 0, 3], sizes = [1, 16, 16], strides = [1, 1, 1]} : vector<1x16x22xf32> to vector<1x16x16xf32>
      %516 = vector.broadcast %514 : f32 to vector<1x16x16xf32>
      %517 = arith.mulf %516, %515 : vector<1x16x16xf32>
      %518 = arith.addf %513, %517 : vector<1x16x16xf32>
      %c95 = arith.constant 95 : index
      %519 = memref.load %arg3[%c95] : memref<98xf32, #tpu.memory_space<smem>>
      %520 = vector.extract_strided_slice %498 {offsets = [0, 0, 4], sizes = [1, 16, 16], strides = [1, 1, 1]} : vector<1x16x22xf32> to vector<1x16x16xf32>
      %521 = vector.broadcast %519 : f32 to vector<1x16x16xf32>
      %522 = arith.mulf %521, %520 : vector<1x16x16xf32>
      %523 = arith.addf %518, %522 : vector<1x16x16xf32>
      %c96 = arith.constant 96 : index
      %524 = memref.load %arg3[%c96] : memref<98xf32, #tpu.memory_space<smem>>
      %525 = vector.extract_strided_slice %498 {offsets = [0, 0, 5], sizes = [1, 16, 16], strides = [1, 1, 1]} : vector<1x16x22xf32> to vector<1x16x16xf32>
      %526 = vector.broadcast %524 : f32 to vector<1x16x16xf32>
      %527 = arith.mulf %526, %525 : vector<1x16x16xf32>
      %528 = arith.addf %523, %527 : vector<1x16x16xf32>
      %c97 = arith.constant 97 : index
      %529 = memref.load %arg3[%c97] : memref<98xf32, #tpu.memory_space<smem>>
      %530 = vector.extract_strided_slice %498 {offsets = [0, 0, 6], sizes = [1, 16, 16], strides = [1, 1, 1]} : vector<1x16x22xf32> to vector<1x16x16xf32>
      %531 = vector.broadcast %529 : f32 to vector<1x16x16xf32>
      %532 = arith.mulf %531, %530 : vector<1x16x16xf32>
      %533 = arith.addf %528, %532 : vector<1x16x16xf32>
      %534 = arith.addf %280, %533 : vector<1x16x16xf32>
      %c0_94 = arith.constant 0 : index
      %535 = memref.load %arg4[%c0_94] : memref<1xf32, #tpu.memory_space<smem>>
      %536 = vector.broadcast %535 : f32 to vector<1x16x16xf32>
      %537 = arith.addf %534, %536 : vector<1x16x16xf32>
      %538 = arith.negf %537 : vector<1x16x16xf32>
      %539 = math.exp %538 : vector<1x16x16xf32>
      %cst_95 = arith.constant 1.000000e+00 : f32
      %540 = vector.broadcast %cst_95 : f32 to vector<1x16x16xf32>
      %541 = arith.addf %540, %539 : vector<1x16x16xf32>
      %542 = arith.divf %540, %541 : vector<1x16x16xf32>
      %c0_96 = arith.constant 0 : index
      %c0_97 = arith.constant 0 : index
      %c0_98 = arith.constant 0 : index
      %543 = vector.load %arg5[%c0_96, %c0_97, %c0_98] : memref<1x16x16xf32, #tpu.memory_space<vmem>>, vector<1x16x16xf32>
      tpu.vector_store %arg5[%c0_96, %c0_97, %c0_98], %542 {strides = array<i32>} : memref<1x16x16xf32, #tpu.memory_space<vmem>>, vector<1x16x16xf32>,
    } else {
    }
    return
  }
  func.func @transform_0(%arg0: i32, %arg1: i32) -> (i32, i32, i32, i32) {
    %c0_i32 = arith.constant 0 : i32
    %c0_i32_0 = arith.constant 0 : i32
    %c0_i32_1 = arith.constant 0 : i32
    return %arg0, %arg1, %c0_i32, %c0_i32_0 : i32, i32, i32, i32
  }
  func.func @transform_1(%arg0: i32, %arg1: i32) -> i32 {
    %c0_i32 = arith.constant 0 : i32
    %c0_i32_0 = arith.constant 0 : i32
    return %c0_i32 : i32
  }
  func.func @transform_2(%arg0: i32, %arg1: i32) -> i32 {
    %c0_i32 = arith.constant 0 : i32
    %c0_i32_0 = arith.constant 0 : i32
    return %c0_i32 : i32
  }
  func.func @transform_3(%arg0: i32, %arg1: i32) -> (i32, i32, i32) {
    %c0_i32 = arith.constant 0 : i32
    %c0_i32_0 = arith.constant 0 : i32
    %c0_i32_1 = arith.constant 0 : i32
    return %arg0, %c0_i32, %c0_i32_0 : i32, i32, i32
  }
}

</mosaic_0001>

<bundles_post_ra>
// kernel: tpu_custom_call.1
= control target key start
LH: loop header
LB: loop body
LE: loop exit
PB: predicated region body
PF: predicated region fallthrough
CT: control target
= control target key end

     0   :  { %s3073_s0 = inlined_call_operand.hbm [shape: f32[2,4,16,16], index: 0, kind: input, shape index: {}]   ;;  %s3074_s1 = inlined_call_operand.hbm [shape: f32[98], index: 1, kind: input, shape index: {}]   ;;  %s3075_s2 = inlined_call_operand.<no memory space> [shape: f32[1], index: 2, kind: input, shape index: {}]   ;;  %s3076_s3 = inlined_call_operand.hbm [shape: f32[2,16,16], index: 3, kind: output, shape index: {}]  }
   0x1   :  { %3090 = sst [smem:[#allocation22_spill]] %s3074_s1 }
   0x2   :  { %3091 = sst [smem:[#allocation23_spill]] %s3076_s3 }
   0x3   :  { %8 = sst [smem:[#allocation6]] %s3075_s2 }
   0x4   :  { %9 = vsyncpa [#allocation8], 0 }
   0x5   :  { %11 = vsyncpa [#allocation8 + $0x1], 0 }
   0x6   :  { %12 = vsyncpa [#allocation10], 0 }
   0x7   :  { %13 = vsyncpa [#allocation9], 0 }
   0x8   :  { %15 = vsyncpa [#allocation9 + $0x1], 0  ;;  %s2173_s14 = smov 0   ;;  %s2175_s15 = smov 0  }
   0x9   :  { %s2177_s16 = smov 0   ;;  %s2179_s17 = smov 0  }
   0xa   :  { %s2181_s18 = smov 0   ;;  %s2183_s19 = smov 0  }
   0xb   :  { %s2185_s20 = smov 0   ;;  %s2187_s2 = smov 0  }
   0xc   :  { %s2189_s21 = smov 0   ;;  %s2191_s22 = smov 0  }
   0xd   :  { %s2193_s23 = smov 0  }
   0xe LB: > { %3092 = sst [smem:[#allocation16_spill]] %s2091_s14  ;;  %s1705_s24 = sadd.s32 4294967295, %s2131_s23   ;;  %s2131_s23 = sphi %s2193_s23, %s3129_s23   ;;  %s2127_s22 = sphi %s2191_s22, %s3128_s22   ;;  %s2123_s21 = sphi %s2189_s21, %s3120_s21   ;;  %s2119_s2 = sphi %s2187_s2, %s3127_s2   ;;  %s2115_s20 = sphi %s2185_s20, %s3119_s20   ;;  %s2111_s19 = sphi %s2183_s19, %s3126_s19   ;;  %s2107_s18 = sphi %s2181_s18, %s3125_s18   ;;  %s2103_s17 = sphi %s2179_s17, %s3124_s17   ;;  %s2099_s16 = sphi %s2177_s16, %s3123_s16   ;;  %s2095_s15 = sphi %s2175_s15, %s3122_s15   ;;  %s2091_s14 = sphi %s2173_s14, %s3121_s14  }
   0xf   : > { %3093 = sst [smem:[#allocation17_spill]] %s2123_s21  ;;  %s1706_s25 = sadd.s32 4294967294, %s2131_s23  }
  0x10   : > { %3094 = sst [smem:[#allocation18_spill]] %s2131_s23  ;;  %p49_p0 = scmp.ne.s32.totalorder %s2111_s19, %s2107_s18 }
  0x11   : > { %p50_p1 = scmp.eq.s32.totalorder %s2131_s23, 0  ;;  %p55_p2 = scmp.ne.s32.totalorder %s2107_s18, %s2103_s17 }
  0x12   : > { %p2233_p3 = scmp.eq.s32.totalorder %s1705_s24, 0  ;;  %p120_p5 = scmp.ne.s32.totalorder %s2099_s16, %s2095_s15 }
  0x13   : > { %p2238_p4 = por %p50_p1, %p49_p0  ;;  %p121_p7 = scmp.eq.s32.totalorder %s1705_s24, 7 }
  0x14   : > { %s3095_s27 = scalar_select %p2233_p3, 1, 0 }
  0x15   : > { %p2246_p6 = por %p2233_p3, %p55_p2  ;;  %p126_p8 = scmp.ne.s32.totalorder %s2095_s15, %s2091_s14 }
  0x16   : > { %p127_p9 = scmp.eq.s32.totalorder %s1706_s25, 7  ;;  %p2252_p10 = por %p121_p7, %p120_p5 }
  0x17   : > { %s3097_s30 = scalar_select %p2246_p6, 1, 0 }
  0x18   : > { %s3098_s4 = scalar_select %p2252_p10, 1, 0 }
  0x19   : > { %p1707_p11 = scmp.ge.s32.totalorder %s2131_s23, 1  ;;  %p2257_p12 = por %p127_p9, %p126_p8 }
  0x1a   : > { %3099 = sst [smem:[#allocation19_spill]] %s3098_s4  ;;  %p134_p13 = scmp.lt.s32.totalorder %s2131_s23, 9 }
  0x1b   : > { %s3100_s5 = scalar_select %p2257_p12, 1, 0 }
  0x1c   : > { %p2262_p0 = pnand %p1707_p11, %p134_p13  ;;  %p1846_p1 = scmp.lt.s32.totalorder %s2131_s23, 8 }
  0x1d   : > { %3101 = sst [smem:[#allocation20_spill]] %s3100_s5  ;;  %s30_s8 = sadd.s32 1, %s2123_s21 }
  0x1e   : > { %p1833_p2 = pneg %p2262_p0  ;;  %p2271_p6 = pnand %p1846_p1, %p2238_p4 }
  0x1f   : > { %p2278_p7 = scmp.ge.s32.totalorder %s30_s8, 4  ;;  %s3105_s1 = sld [smem:[#allocation22_spill]] }
  0x20   : > { %p1834_p5 = pnand %p1833_p2, %p2233_p3 }
  0x22   : > { %p1964_p9 = pneg %p1834_p5 }
  0x25   : > { %s1962_s12 = scalar_lea.hbm %s3105_s1, 16 }
  0x26   : > { %p1963_p8 = scmp.ne.s32.totalorder %s3105_s1, %s1962_s12  ;;  %p1969_p13 = scmp.lt.u32.totalorder %s1962_s12, %s3105_s1 }
  0x28   : > { %p1965_p4 = pnand %p1964_p9, %p1963_p8 }
  0x2a   : > { %p1966_p11 = pneg %p1965_p4 }
  0x2c   : > { %p1971_p1 = pnand %p1969_p13, %p1966_p11 }
  0x2e   : > { %1974 = shalt.err (!%p1971_p1)
}
  0x2f   : > { %s2133_s29 = smov [#allocation11]   ;;  %s3131_s8 = smov (%p2278_p7, %s30_s8), 0 }
  0x30   : > { %1836 = dma.hbm_to_smem (!%p1834_p5), %s3105_s1, 16, %s2133_s29, [#allocation10]  }
  0x31   : > { %3106 = sst [smem:[#allocation21_spill]] %s3131_s8  ;;  %s33_s10 = sadd.s32 1, %s2127_s22 }
  0x32   : > { %s159_s11 = sand.u32 1, %s2111_s19   ;;  %s3133_s10 = smov (!%p2278_p7, %s33_s10), %s2127_s22 }
  0x33   : > { %s38_s26 = ssub.s32 %s2123_s21, %s3131_s8  ;;  %p35_p2 = scmp.ge.s32.totalorder %s3133_s10, 2 }
  0x34   : > { %s1710_s28 = sshll.u32 %s159_s11, 4  ;;  %s1711_s12 = sshll.u32 %s2123_s21, 1 }
  0x35   : > { %s3135_s10 = smov (%p35_p2, %s3133_s10), 0  ;;  %s1712_s13 = sshll.u32 %s2127_s22, 3 }
  0x36   : > { %s163_s17 = scalar_lea.vmem [#allocation7], %s1710_s28  ;;  %s37_s25 = ssub.s32 %s2127_s22, %s3135_s10 }
  0x37   : > { %s172_s24 = sshll.u32 %s163_s17, 4  ;;  %s169_s29 = sadd.s32 %s1712_s13, %s1711_s12  ;;  %s2326_s24 = int_to_ptr.vmem [resolvable:$true] %s172_s24 }
  0x38   : > { %s39_s9 = sor.u32 %s38_s26, %s37_s25  ;;  %p108_p5 = scmp.eq.s32.totalorder %s37_s25, 0 }
  0x39   : > { %p40_p8 = scmp.eq.s32.totalorder %s39_s9, 0  ;;  %s1713_s1 = sshll.u32 %s169_s29, 7 }
  0x3a   : > { %s3107_s5 = sadd.s32 1, %s2099_s16  ;;  %s3108_s8 = sadd.s32 1, %s2111_s19 }
  0x3b   : > { %s2314_s14 = scalar_select %p108_p5, %s2099_s16, %s3107_s5  }
  0x3c   : > { %s2319_s23 = scalar_select %p40_p8, %s2111_s19, %s3108_s8  }
  0x3d   : > { %s2324_s4 = scalar_lea.hbm %s3073_s0, %s1713_s1  ;;  %s2328_s26 = scalar_lea.sflag [#allocation8], %s159_s11 }
  0x3e   : > { %s1975_s28 = scalar_lea.hbm %s2324_s4, 256  ;;  %p1977_p9 = pneg %p2271_p6 }
  0x3f   : > { %p1976_p7 = scmp.ne.s32.totalorder %s2324_s4, %s1975_s28  ;;  %s1980_s1 = scalar_lea.hbm %s3073_s0, 2048 }
  0x40   : > { %p1981_p13 = scmp.lt.u32.totalorder %s2324_s4, %s3073_s0  ;;  %p1982_p1 = scmp.lt.u32.totalorder %s1980_s1, %s1975_s28 }
  0x41   : > { %p1978_p4 = pnand %p1977_p9, %p1976_p7  ;;  %p1984_p5 = scmp.lt.u32.totalorder %s1975_s28, %s2324_s4 }
  0x42   : > { %p1983_p2 = por %p1982_p1, %p1981_p13 }
  0x43   : > { %p1979_p11 = pneg %p1978_p4 }
  0x44   : > { %p1985_p8 = por %p1984_p5, %p1983_p2 }
  0x46   : > { %p1986_p12 = pnand %p1985_p8, %p1979_p11 }
  0x48   : > { %1989 = shalt.err (!%p1986_p12)
}
  0x49   : > { %s1990_s11 = scalar_lea.vmem %s2326_s24, 256  ;;  %s2134_s12 = smov [#allocation7]  }
  0x4a   : > { %p1991_p7 = scmp.ne.s32.totalorder %s2326_s24, %s1990_s11  ;;  %s1995_s13 = sshll.u32 %s2134_s12, 4  ;;  %s1996_s13 = int_to_ptr.vmem [resolvable:$false] %s1995_s13 }
  0x4b   : > { %s1997_s17 = scalar_lea.vmem %s1996_s13, 512  ;;  %p1998_p3 = scmp.lt.s32.totalorder %s2326_s24, %s1996_s13 }
  0x4c   : > { %p1993_p4 = pnand %p1991_p7, %p1977_p9  ;;  %p1999_p13 = scmp.lt.s32.totalorder %s1997_s17, %s1990_s11 }
  0x4e   : > { %p1994_p10 = pneg %p1993_p4  ;;  %p2000_p1 = por %p1999_p13, %p1998_p3 }
  0x50   : > { %p2001_p2 = pnand %p2000_p1, %p1994_p10 }
  0x52   : > { %2004 = shalt.err (!%p2001_p2)
}
  0x53   : > { %s2135_s25 = smov 128   ;;  %s2136_s29 = smov 8  }
  0x54   : > { %1840 = dma.hbm_to_vmem [thread:$0]  (!%p2271_p6), %s2324_s4, 256, %s2326_s24, %s2328_s26, %s2135_s25, %s2135_s25, %s2136_s29  }
  0x55   : > { %184 = sbr.rel (%p2262_p0) target bundleno = 750 (0x2ee), region = 32  ;;  %s186_s9 = sand.u32 (!%p2262_p0), 1, %s2107_s18  }
  0x56   : > { %s1715_s28 = sshll.u32 (!%p2262_p0), %s186_s9, 4  ;;  %s187_s5 = scalar_lea.sflag (!%p2262_p0), [#allocation8], %s186_s9 }
  0x57   : > { %s190_s3 = scalar_lea.vmem (!%p2262_p0), [#allocation7], %s1715_s28  ;;  %p3109_p3 = scmp.ne.s32.totalorder (!%p2262_p0), %s3097_s30, 0 }
  0x5c   : > { %2078 = dma.done.wait (%p3109_p3), %s187_s5, 256  }
  0x5d   : > { %2080 = vsyncadd (%p3109_p3), %s187_s5, 4294967040  ;;  %p3110_p10 = scmp.ne.s32.totalorder %s3095_s27, 0 }
  0x5f   : > { %2082 = dma.done.wait (%p3110_p10), [#allocation10], 16  }
  0x60   : > { %2084 = vsyncadd (%p3110_p10), [#allocation10], 4294967280 }
  0x61   : > { %199 = sfence }
  0x62   : > { %s215_s4 = sand.u32 1, %s2095_s15   ;;  %p1718_p6 = scmp.ne.s32.totalorder %s2115_s20, 0 }
  0x63   : > { %s1717_s6 = sshll.u32 %s215_s4, 4  ;;  %vm222_vm0 = vcmask (!%p1718_p6), 130048   ;;  %v2137_v0 = vmov (!%p1718_p6), 0.0   ;;  %v2138_v1 = vmov (!%p1718_p6), -inf  }
  0x64   : > { %s2370_s7 = scalar_lea.vmem [#allocation12], %s1717_s6  ;;  %221 = sbr.rel (%p1718_p6) target bundleno = 107 (0x6b), region = 44  ;;  %223 = vst.msk [vmem:[#allocation2] sm:$0xff] (!%p1718_p6), %vm222_vm0, %v2137_v0  ;;  %224 = vst.msk [vmem:[#allocation2 + $0x8] sm:$0xff] (!%p1718_p6), %vm222_vm0, %v2137_v0 }
  0x65   : > { %225 = vst.msk [vmem:[#allocation3] sm:$0xff] (!%p1718_p6), %vm222_vm0, %v2138_v1  ;;  %226 = vst.msk [vmem:[#allocation3 + $0x8] sm:$0xff] (!%p1718_p6), %vm222_vm0, %v2138_v1 }
  0x6b PF: > { %v227_v2 = vld [vmem:[#allocation2] sm:$0xff]  ;;  %vm237_vm1 = vcmask 130048   ;;  %v228_v4 = vld [vmem:[#allocation2 + $0x8] sm:$0xff]  ;;  %p1719_p12 = scmp.ne.s32.totalorder %s2115_s20, 3 }
  0x6c   : > { %v231_v3 = vld [vmem:[%s190_s3] sm:$0xff]  ;;  %v232_v6 = vld [vmem:[%s190_s3 + $0x8] sm:$0xff]  ;;  %vm251_vm2 = vcmask (!%p1719_p12), 23552   ;;  %v2139_v13 = vmov (!%p1719_p12), 0.0   ;;  %vm254_vm3 = vcmask (!%p1719_p12), 179352   ;;  %s2140_s27 = smov (!%p1719_p12), 3  }
  0x6d   : > { %v233_v5 = vadd.f32 %v231_v3, %v227_v2  ;;  %v229_v7 = vld [vmem:[#allocation3] sm:$0xff]  ;;  %v230_v8 = vld [vmem:[#allocation3 + $0x8] sm:$0xff]  ;;  %v234_v9 = vadd.f32 %v232_v6, %v228_v4  ;;  %245 = sbr.rel (%p1719_p12) target bundleno = 722 (0x2d2), region = 48  ;;  %252 = vst.msk [vmem:[#allocation4 + $0x3] sm:$0xff] (!%p1719_p12), %vm251_vm2, %v2139_v13  ;;  %253 = vst.msk [vmem:[#allocation4 + $0xb] sm:$0xff] (!%p1719_p12), %vm251_vm2, %v2139_v13  ;;  %vm248_vm4 = vcmask (!%p1719_p12), 174080  }
  0x6e   : > { %v235_v10 = vmax.f32 %v229_v7, %v231_v3  ;;  %v236_v11 = vmax.f32 %v230_v8, %v232_v6  ;;  %270 = vst.msk [vmem:[#allocation5 + $0x3] sm:$0xff] (!%p1719_p12), %vm251_vm2, %v2139_v13  ;;  %271 = vst.msk [vmem:[#allocation5 + $0xb] sm:$0xff] (!%p1719_p12), %vm251_vm2, %v2139_v13  ;;  %vm265_vm5 = vcmask (!%p1719_p12), 154648   ;;  %s1720_s20 = sld [smem:[#allocation11 + $0x1]] (!%p1719_p12)  ;;  %s1721_s30 = sld [smem:[#allocation11 + $0x2]] (!%p1719_p12) }
  0x6f   : > { %238 = vst.msk [vmem:[#allocation2] sm:$0xff] %vm237_vm1, %v233_v5  ;;  %239 = vst.msk [vmem:[#allocation2 + $0x8] sm:$0xff] %vm237_vm1, %v234_v9  ;;  %v246_v12 = vmul.f32 (!%p1719_p12), 0.25, %v233_v5  ;;  %v247_v14 = vmul.f32 (!%p1719_p12), 0.25, %v234_v9  ;;  %s1722_s24 = sld [smem:[#allocation11 + $0x3]] (!%p1719_p12)  ;;  %s1723_s26 = sld [smem:[#allocation11 + $0x4]] (!%p1719_p12) }
  0x70   : > { %240 = vst.msk [vmem:[#allocation3] sm:$0xff] %vm237_vm1, %v235_v10  ;;  %241 = vst.msk [vmem:[#allocation3 + $0x8] sm:$0xff] %vm237_vm1, %v236_v11  ;;  %276 = vrot.lane.b32.xlu1 (!%p1719_p12), %v235_v10, %s2140_s27  ;;  %s2141_s1 = smov (!%p1719_p12), 127   ;;  %s1724_s21 = sld [smem:[#allocation11 + $0x5]] (!%p1719_p12) }
  0x71   : > { %259 = vrot.lane.b32.xlu0 (!%p1719_p12), %v246_v12, %s2140_s27  ;;  %255 = vst.msk [vmem:[#allocation4 + $0x3] sm:$0xff] (!%p1719_p12), %vm254_vm3, %v2139_v13  ;;  %256 = vst.msk [vmem:[#allocation4 + $0xb] sm:$0xff] (!%p1719_p12), %vm254_vm3, %v2139_v13  ;;  %s2142_s8 = smov (!%p1719_p12), 126   ;;  %s1725_s11 = sld [smem:[#allocation11 + $0x6]] (!%p1719_p12) }
  0x72   : > { %272 = vst.msk [vmem:[#allocation5 + $0x3] sm:$0xff] (!%p1719_p12), %vm254_vm3, %v2139_v13  ;;  %273 = vst.msk [vmem:[#allocation5 + $0xb] sm:$0xff] (!%p1719_p12), %vm254_vm3, %v2139_v13  ;;  %s2143_s12 = smov (!%p1719_p12), 125   ;;  %s1727_s13 = sld [smem:[#allocation11 + $0x8]] (!%p1719_p12) }
  0x73   : > { %249 = vst.msk [vmem:[#allocation4] sm:$0x7] (!%p1719_p12), %vm248_vm4, %v2139_v13  ;;  %250 = vst.msk [vmem:[#allocation4 + $0x13] sm:$0x7] (!%p1719_p12), %vm248_vm4, %v2139_v13  ;;  %s2144_s17 = smov (!%p1719_p12), 124   ;;  %s1728_s25 = sld [smem:[#allocation11 + $0x9]] (!%p1719_p12) }
  0x74   : > { %268 = vst.msk [vmem:[#allocation5] sm:$0x7] %vm248_vm4, %v2139_v13  ;;  %269 = vst.msk [vmem:[#allocation5 + $0x13] sm:$0x7] %vm248_vm4, %v2139_v13  ;;  %278 = vrot.lane.b32.xlu1 %v236_v11, %s2140_s27  ;;  %v293_v19 = vstv %s1720_s20  ;;  %v307_v22 = vstv %s1721_s30  ;;  %s2145_s29 = smov 123   ;;  %s1729_s9 = sld [smem:[#allocation11 + $0xa]] }
  0x75   : > { %261 = vrot.lane.b32.xlu0 %v247_v14, %s2140_s27  ;;  %v321_v26 = vstv %s1722_s24  ;;  %v335_v29 = vstv %s1723_s26  ;;  %s2146_s28 = smov 122   ;;  %s1730_s5 = sld [smem:[#allocation11 + $0xb]] }
  0x76   : > { %v349_v32 = vstv %s1724_s21  ;;  %s1731_s3 = sld [smem:[#allocation11 + $0xc]]  ;;  %s1732_s6 = sld [smem:[#allocation11 + $0xd]] }
  0x77   : > { %v363_v35 = vstv %s1725_s11  ;;  %s1734_s27 = sld [smem:[#allocation11 + $0xf]]  ;;  %s1735_s20 = sld [smem:[#allocation11 + $0x10]] }
  0x78   : > { %v385_v39 = vstv %s1727_s13  ;;  %s1736_s30 = sld [smem:[#allocation11 + $0x11]]  ;;  %s1737_s24 = sld [smem:[#allocation11 + $0x12]] }
  0x79   : > { %v399_v42 = vstv %s1728_s25  ;;  %s1738_s26 = sld [smem:[#allocation11 + $0x13]]  ;;  %s1739_s21 = sld [smem:[#allocation11 + $0x14]] }
  0x7a   : > { %v413_v46 = vstv %s1729_s9  ;;  %s1741_s11 = sld [smem:[#allocation11 + $0x16]]  ;;  %s1742_s13 = sld [smem:[#allocation11 + $0x17]] }
  0x7b   : > { %v427_v49 = vstv %s1730_s5  ;;  %s1743_s25 = sld [smem:[#allocation11 + $0x18]]  ;;  %s1744_s9 = sld [smem:[#allocation11 + $0x19]] }
  0x7c   : > { %v441_v52 = vstv %s1731_s3  ;;  %v455_v55 = vstv %s1732_s6  ;;  %s1745_s5 = sld [smem:[#allocation11 + $0x1a]]  ;;  %s1746_s3 = sld [smem:[#allocation11 + $0x1b]] }
  0x7d   : > { %v477_v59 = vstv %s1734_s27  ;;  %v491_v62 = vstv %s1735_s20  ;;  %s1748_s6 = sld [smem:[#allocation11 + $0x1d]]  ;;  %s1749_s27 = sld [smem:[#allocation11 + $0x1e]] }
  0x7e   : > { %v505_v2 = vstv %s1736_s30  ;;  %v519_v5 = vstv %s1737_s24  ;;  %s1750_s20 = sld [smem:[#allocation11 + $0x1f]]  ;;  %s1751_s30 = sld [smem:[#allocation11 + $0x20]] }
  0x7f   : > { %v533_v8 = vstv %s1738_s26  ;;  %v547_v11 = vstv %s1739_s21  ;;  %s1752_s24 = sld [smem:[#allocation11 + $0x21]]  ;;  %s1753_s26 = sld [smem:[#allocation11 + $0x22]] }
  0x80   : > { %s2506_s21 = sld [smem:[#allocation11 + $0x24]] }
  0xe2   : > { %v277_v15 = vpop.permute.xlu1 %276 }
  0xe3   : > { %v260_v16 = vpop.permute.xlu0 %259  ;;  %282 = vst.msk [vmem:[#allocation5 + $0x3] sm:$0xff] %vm265_vm5, %v277_v15  ;;  %v569_v15 = vstv %s1741_s11  ;;  %s2512_s11 = sld [smem:[#allocation11 + $0x25]] }
  0xe4   : > { %266 = vst.msk [vmem:[#allocation4 + $0x3] sm:$0xff] %vm265_vm5, %v260_v16 }
  0xe6   : > { %v279_v17 = vpop.permute.xlu1 %278 }
  0xe7   : > { %v262_v18 = vpop.permute.xlu0 %261  ;;  %283 = vst.msk [vmem:[#allocation5 + $0xb] sm:$0xff] %vm265_vm5, %v279_v17 }
  0xe8   : > { %267 = vst.msk [vmem:[#allocation4 + $0xb] sm:$0xff] %vm265_vm5, %v262_v18  ;;  %v583_v18 = vstv %s1742_s13  ;;  %s2516_s13 = sld [smem:[#allocation11]] }
  0xeb   : > { %v2378_v20 = vld [vmem:[#allocation4] sm:$0xff] }
  0xec   : > { %v294_v21 = vmul.f32 %v293_v19, %v2378_v20  ;;  %v308_v24 = vmul.f32 %v307_v22, %v2378_v20  ;;  %v322_v27 = vmul.f32 %v321_v26, %v2378_v20  ;;  %v336_v30 = vmul.f32 %v335_v29, %v2378_v20  ;;  %v2402_v38 = vld [vmem:[#allocation4 + $0x1] sm:$0xff] }
  0xed   : > { %v350_v33 = vmul.f32 %v349_v32, %v2378_v20  ;;  %v364_v36 = vmul.f32 %v363_v35, %v2378_v20  ;;  %v386_v40 = vmul.f32 %v385_v39, %v2402_v38  ;;  %v400_v44 = vmul.f32 %v399_v42, %v2402_v38  ;;  %v2430_v58 = vld [vmem:[#allocation4 + $0x2] sm:$0xff] }
  0xee   : > { %298 = vrot.lane.b32.xlu0 %v294_v21, %s2141_s1  ;;  %v414_v47 = vmul.f32 %v413_v46, %v2402_v38  ;;  %v428_v50 = vmul.f32 %v427_v49, %v2402_v38  ;;  %v442_v53 = vmul.f32 %v441_v52, %v2402_v38  ;;  %v456_v56 = vmul.f32 %v455_v55, %v2402_v38  ;;  %v2458_v14 = vld [vmem:[#allocation4 + $0x3] sm:$0xff] }
  0xef   : > { %v2382_v23 = vld [vmem:[#allocation4 + $0x8] sm:$0xff]  ;;  %v478_v60 = vmul.f32 %v477_v59, %v2430_v58  ;;  %v492_v0 = vmul.f32 %v491_v62, %v2430_v58  ;;  %v506_v3 = vmul.f32 %v505_v2, %v2430_v58  ;;  %v520_v6 = vmul.f32 %v519_v5, %v2430_v58 }
  0xf0   : > { %v295_v25 = vmul.f32 %v293_v19, %v2382_v23  ;;  %v309_v28 = vmul.f32 %v307_v22, %v2382_v23  ;;  %v323_v31 = vmul.f32 %v321_v26, %v2382_v23  ;;  %v337_v34 = vmul.f32 %v335_v29, %v2382_v23  ;;  %v2408_v43 = vld [vmem:[#allocation4 + $0x9] sm:$0xff] }
  0xf1   : > { %v351_v37 = vmul.f32 %v349_v32, %v2382_v23  ;;  %v365_v41 = vmul.f32 %v363_v35, %v2382_v23  ;;  %v387_v45 = vmul.f32 %v385_v39, %v2408_v43  ;;  %v401_v48 = vmul.f32 %v399_v42, %v2408_v43  ;;  %v2436_v63 = vld [vmem:[#allocation4 + $0xa] sm:$0xff] }
  0xf2   : > { %312 = vrot.lane.b32.xlu0 %v308_v24, %s2142_s8  ;;  %300 = vrot.lane.b32.xlu1 %v295_v25, %s2141_s1  ;;  %v415_v51 = vmul.f32 %v413_v46, %v2408_v43  ;;  %v429_v54 = vmul.f32 %v427_v49, %v2408_v43  ;;  %v443_v57 = vmul.f32 %v441_v52, %v2408_v43  ;;  %v2464_v19 = vld [vmem:[#allocation4 + $0xb] sm:$0xff]  ;;  %v597_v24 = vstv %s1743_s25  ;;  %s2523_s25 = sld [smem:[#allocation11 + $0x26]] }
  0xf3   : > { %v457_v61 = vmul.f32 %v455_v55, %v2408_v43  ;;  %v479_v1 = vmul.f32 %v477_v59, %v2436_v63  ;;  %v493_v4 = vmul.f32 %v491_v62, %v2436_v63  ;;  %v507_v7 = vmul.f32 %v505_v2, %v2436_v63  ;;  %v2492_v42 = vld [vmem:[#allocation4 + $0xc] sm:$0xff] }
  0xf4   : > { %v534_v9 = vmul.f32 %v533_v8, %v2430_v58  ;;  %v521_v10 = vmul.f32 %v519_v5, %v2436_v63  ;;  %v548_v12 = vmul.f32 %v547_v11, %v2430_v58  ;;  %v535_v13 = vmul.f32 %v533_v8, %v2436_v63 }
  0xf5   : > { %v570_v16 = vmul.f32 %v569_v15, %v2458_v14  ;;  %v549_v17 = vmul.f32 %v547_v11, %v2436_v63  ;;  %v584_v21 = vmul.f32 %v583_v18, %v2458_v14  ;;  %v571_v22 = vmul.f32 %v569_v15, %v2464_v19 }
  0xf6   : > { %326 = vrot.lane.b32.xlu0 %v322_v27, %s2143_s12  ;;  %314 = vrot.lane.b32.xlu1 %v309_v28, %s2142_s8  ;;  %v598_v25 = vmul.f32 %v597_v24, %v2458_v14  ;;  %v585_v26 = vmul.f32 %v583_v18, %v2464_v19  ;;  %v611_v27 = vstv %s1744_s9  ;;  %v599_v29 = vmul.f32 %v597_v24, %v2464_v19  ;;  %s2532_s9 = sld [smem:[#allocation11 + $0x27]] }
  0xf7   : > { %v612_v28 = vmul.f32 %v611_v27, %v2458_v14  ;;  %v613_v32 = vmul.f32 %v611_v27, %v2464_v19  ;;  %v689_v46 = vstv %s1750_s20  ;;  %v703_v49 = vstv %s1751_s30  ;;  %s2567_s20 = sld [smem:[#allocation11 + $0x2c]]  ;;  %s2577_s30 = sld [smem:[#allocation11 + $0x32]] }
  0xf8   : > { %v717_v52 = vstv %s1752_s24  ;;  %v731_v55 = vstv %s1753_s26  ;;  %v287_v5 = vstv %s2516_s13  ;;  %v781_v11 = vstv %s2523_s25  ;;  %s2586_s24 = sld [smem:[#allocation11 + $0x33]]  ;;  %s2595_s26 = sld [smem:[#allocation11 + $0x34]] }
  0xf9   : > { %v719_v59 = vmul.f32 %v717_v52, %v2492_v42  ;;  %v733_v2 = vmul.f32 %v731_v55, %v2492_v42  ;;  %v289_v18 = vmul.f32 %v287_v5, %v2382_v23  ;;  %s2613_s13 = sld [smem:[#allocation11 + $0x36]]  ;;  %s2622_s25 = sld [smem:[#allocation11 + $0x37]] }
  0xfa   : > { %340 = vrot.lane.b32.xlu0 %v336_v30, %s2144_s17  ;;  %328 = vrot.lane.b32.xlu1 %v323_v31, %s2143_s12  ;;  %v625_v30 = vstv %s1745_s5  ;;  %s2541_s5 = sld [smem:[#allocation11 + $0x28]] }
  0xfb   : > { %v626_v31 = vmul.f32 %v625_v30, %v2458_v14  ;;  %v627_v35 = vmul.f32 %v625_v30, %v2464_v19 }
  0xfe   : > { %354 = vrot.lane.b32.xlu0 %v350_v33, %s2145_s29  ;;  %342 = vrot.lane.b32.xlu1 %v337_v34, %s2144_s17  ;;  %v639_v33 = vstv %s1746_s3  ;;  %s2545_s3 = sld [smem:[#allocation11 + $0x7]] }
  0xff   : > { %v640_v34 = vmul.f32 %v639_v33, %v2458_v14 }
 0x100   : > { %v809_v30 = vstv %s2541_s5  ;;  %s2637_s5 = sld [smem:[#allocation11 + $0x3a]] }
 0x102   : > { %368 = vrot.lane.b32.xlu0 %v364_v36, %s2146_s28  ;;  %356 = vrot.lane.b32.xlu1 %v351_v37, %s2145_s29  ;;  %v2486_v36 = vld [vmem:[#allocation4 + $0x4] sm:$0xff]  ;;  %v661_v37 = vstv %s1748_s6  ;;  %s2551_s6 = sld [smem:[#allocation11 + $0x29]] }
 0x103   : > { %v662_v39 = vmul.f32 %v661_v37, %v2486_v36 }
 0x106   : > { %390 = vrot.lane.b32.xlu0 %v386_v40, %s2141_s1  ;;  %370 = vrot.lane.b32.xlu1 %v365_v41, %s2146_s28  ;;  %v641_v40 = vmul.f32 %v639_v33, %v2464_v19  ;;  %v675_v41 = vstv %s1749_s27  ;;  %s2558_s27 = sld [smem:[#allocation11 + $0x2b]] }
 0x10a   : > { %404 = vrot.lane.b32.xlu0 %v400_v44, %s2142_s8  ;;  %392 = vrot.lane.b32.xlu1 %v387_v45, %s2141_s1  ;;  %v676_v44 = vmul.f32 %v675_v41, %v2486_v36  ;;  %v663_v45 = vmul.f32 %v661_v37, %v2492_v42 }
 0x10e   : > { %418 = vrot.lane.b32.xlu0 %v414_v47, %s2143_s12  ;;  %406 = vrot.lane.b32.xlu1 %v401_v48, %s2142_s8  ;;  %v690_v47 = vmul.f32 %v689_v46, %v2486_v36  ;;  %v677_v48 = vmul.f32 %v675_v41, %v2492_v42 }
 0x112   : > { %432 = vrot.lane.b32.xlu0 %v428_v50, %s2144_s17  ;;  %420 = vrot.lane.b32.xlu1 %v415_v51, %s2143_s12  ;;  %v704_v50 = vmul.f32 %v703_v49, %v2486_v36  ;;  %v691_v51 = vmul.f32 %v689_v46, %v2492_v42 }
 0x116   : > { %446 = vrot.lane.b32.xlu0 %v442_v53, %s2145_s29  ;;  %434 = vrot.lane.b32.xlu1 %v429_v54, %s2144_s17  ;;  %v718_v53 = vmul.f32 %v717_v52, %v2486_v36  ;;  %v705_v54 = vmul.f32 %v703_v49, %v2492_v42 }
 0x11a   : > { %460 = vrot.lane.b32.xlu0 %v456_v56, %s2146_s28  ;;  %448 = vrot.lane.b32.xlu1 %v443_v57, %s2145_s29  ;;  %v732_v57 = vmul.f32 %v731_v55, %v2486_v36 }
 0x11e   : > { %482 = vrot.lane.b32.xlu0 %v478_v60, %s2141_s1  ;;  %462 = vrot.lane.b32.xlu1 %v457_v61, %s2146_s28  ;;  %v2520_v60 = vld [vmem:[#allocation4 + $0x5] sm:$0xff]  ;;  %v753_v61 = vstv %s2506_s21  ;;  %s2599_s21 = sld [smem:[#allocation11 + $0xe]] }
 0x11f   : > { %v810_v37 = vmul.f32 %v809_v30, %v2520_v60 }
 0x122   : > { %496 = vrot.lane.b32.xlu0 %v492_v0, %s2142_s8  ;;  %484 = vrot.lane.b32.xlu1 %v479_v1, %s2141_s1  ;;  %v754_v1 = vmul.f32 %v753_v61, %v2520_v60 }
 0x126   : > { %510 = vrot.lane.b32.xlu0 %v506_v3, %s2143_s12  ;;  %498 = vrot.lane.b32.xlu1 %v493_v4, %s2142_s8  ;;  %v767_v3 = vstv %s2512_s11  ;;  %v2530_v4 = vld [vmem:[#allocation4 + $0xd] sm:$0xff]  ;;  %s2606_s11 = sld [smem:[#allocation11 + $0x35]] }
 0x127   : > { %v768_v8 = vmul.f32 %v767_v3, %v2520_v60 }
 0x12a   : > { %524 = vrot.lane.b32.xlu0 %v520_v6, %s2144_s17  ;;  %512 = vrot.lane.b32.xlu1 %v507_v7, %s2143_s12 }
 0x12e   : > { %538 = vrot.lane.b32.xlu0 %v534_v9, %s2145_s29  ;;  %526 = vrot.lane.b32.xlu1 %v521_v10, %s2144_s17  ;;  %v755_v9 = vmul.f32 %v753_v61, %v2530_v4  ;;  %v288_v10 = vmul.f32 %v287_v5, %v2378_v20  ;;  %v2592_v5 = vld [vmem:[#allocation5] sm:$0xff] }
 0x132   : > { %552 = vrot.lane.b32.xlu0 %v548_v12, %s2146_s28  ;;  %540 = vrot.lane.b32.xlu1 %v535_v13, %s2145_s29 }
 0x136   : > { %574 = vrot.lane.b32.xlu0 %v570_v16, %s2141_s1  ;;  %554 = vrot.lane.b32.xlu1 %v549_v17, %s2146_s28  ;;  %v782_v16 = vmul.f32 %v781_v11, %v2520_v60  ;;  %v769_v17 = vmul.f32 %v767_v3, %v2530_v4 }
 0x13a   : > { %588 = vrot.lane.b32.xlu0 %v584_v21, %s2142_s8  ;;  %576 = vrot.lane.b32.xlu1 %v571_v22, %s2141_s1  ;;  %v795_v21 = vstv %s2532_s9  ;;  %s2630_s9 = sld [smem:[#allocation11 + $0x39]] }
 0x13b   : > { %v796_v27 = vmul.f32 %v795_v21, %v2520_v60 }
 0x13e   : > { %602 = vrot.lane.b32.xlu0 %v598_v25, %s2143_s12  ;;  %590 = vrot.lane.b32.xlu1 %v585_v26, %s2142_s8 }
 0x142   : > { %616 = vrot.lane.b32.xlu0 %v612_v28, %s2144_s17  ;;  %604 = vrot.lane.b32.xlu1 %v599_v29, %s2143_s12  ;;  %v783_v28 = vmul.f32 %v781_v11, %v2530_v4 }
 0x146   : > { %630 = vrot.lane.b32.xlu0 %v626_v31, %s2145_s29  ;;  %618 = vrot.lane.b32.xlu1 %v613_v32, %s2144_s17  ;;  %v379_v31 = vstv %s2545_s3  ;;  %s2646_s3 = sld [smem:[#allocation11 + $0x3b]] }
 0x147   : > { %v380_v41 = vmul.f32 %v379_v31, %v2402_v38  ;;  %v381_v52 = vmul.f32 %v379_v31, %v2408_v43  ;;  %v2584_v43 = vld [vmem:[#allocation4 + $0xe] sm:$0xff] }
 0x14a   : > { %644 = vrot.lane.b32.xlu0 %v640_v34, %s2146_s28  ;;  %632 = vrot.lane.b32.xlu1 %v627_v35, %s2145_s29 }
 0x14e   : > { %666 = vrot.lane.b32.xlu0 %v662_v39, %s2141_s1  ;;  %646 = vrot.lane.b32.xlu1 %v641_v40, %s2146_s28  ;;  %v797_v39 = vmul.f32 %v795_v21, %v2530_v4 }
 0x152   : > { %680 = vrot.lane.b32.xlu0 %v676_v44, %s2142_s8  ;;  %668 = vrot.lane.b32.xlu1 %v663_v45, %s2141_s1  ;;  %v823_v45 = vstv %s2551_s6  ;;  %s2650_s6 = sld [smem:[#allocation11 + $0x15]] }
 0x153   : > { %v825_v61 = vmul.f32 %v823_v45, %v2530_v4 }
 0x156   : > { %694 = vrot.lane.b32.xlu0 %v690_v47, %s2143_s12  ;;  %682 = vrot.lane.b32.xlu1 %v677_v48, %s2142_s8 }
 0x15a   : > { %708 = vrot.lane.b32.xlu0 %v704_v50, %s2144_s17  ;;  %696 = vrot.lane.b32.xlu1 %v691_v51, %s2143_s12  ;;  %v824_v50 = vmul.f32 %v823_v45, %v2520_v60  ;;  %v811_v51 = vmul.f32 %v809_v30, %v2530_v4 }
 0x15e   : > { %722 = vrot.lane.b32.xlu0 %v718_v53, %s2145_s29  ;;  %710 = vrot.lane.b32.xlu1 %v705_v54, %s2144_s17  ;;  %v2574_v53 = vld [vmem:[#allocation4 + $0x6] sm:$0xff]  ;;  %v845_v54 = vstv %s2558_s27  ;;  %s2657_s27 = sld [smem:[#allocation11 + $0x3c]] }
 0x15f   : > { %v847_v3 = vmul.f32 %v845_v54, %v2584_v43 }
 0x160   : > { %v299_v56 = vpop.permute.xlu0 %298 }
 0x161   : > { %v304_v12 = vadd.f32 %v299_v56, %v288_v10 }
 0x162   : > { %736 = vrot.lane.b32.xlu0 %v732_v57, %s2146_s28  ;;  %724 = vrot.lane.b32.xlu1 %v719_v59, %s2145_s29  ;;  %v846_v59 = vmul.f32 %v845_v54, %v2574_v53  ;;  %v1007_v54 = vstv %s2622_s25  ;;  %s2715_s25 = sld [smem:[#allocation11 + $0x44]] }
 0x164   : > { %v301_v62 = vpop.permute.xlu1 %300  ;;  %v313_v0 = vpop.permute.xlu0 %312 }
 0x165   : > { %v318_v20 = vadd.f32 %v313_v0, %v304_v12  ;;  %v305_v22 = vadd.f32 %v301_v62, %v289_v18  ;;  %v859_v62 = vstv %s2567_s20  ;;  %s2664_s20 = sld [smem:[#allocation11 + $0x3d]] }
 0x166   : > { %758 = vrot.lane.b32.xlu0 %v754_v1, %s2141_s1  ;;  %738 = vrot.lane.b32.xlu1 %v733_v2, %s2146_s28  ;;  %v860_v2 = vmul.f32 %v859_v62, %v2574_v53  ;;  %v861_v11 = vmul.f32 %v859_v62, %v2584_v43 }
 0x168   : > { %v315_v6 = vpop.permute.xlu1 %314  ;;  %v327_v7 = vpop.permute.xlu0 %326 }
 0x169   : > { %v332_v24 = vadd.f32 %v327_v7, %v318_v20  ;;  %v319_v29 = vadd.f32 %v315_v6, %v305_v22  ;;  %v937_v6 = vstv %s2577_s30  ;;  %s2673_s30 = sld [smem:[#allocation11 + $0x3e]] }
 0x16a   : > { %772 = vrot.lane.b32.xlu0 %v768_v8, %s2142_s8  ;;  %760 = vrot.lane.b32.xlu1 %v755_v9, %s2141_s1  ;;  %v938_v10 = vmul.f32 %v937_v6, %v2592_v5 }
 0x16c   : > { %v329_v13 = vpop.permute.xlu1 %328  ;;  %v341_v15 = vpop.permute.xlu0 %340 }
 0x16d   : > { %v346_v23 = vadd.f32 %v341_v15, %v332_v24  ;;  %v333_v32 = vadd.f32 %v329_v13, %v319_v29  ;;  %v951_v13 = vstv %s2586_s24  ;;  %v2604_v15 = vld [vmem:[#allocation5 + $0x8] sm:$0xff]  ;;  %s2681_s24 = sld [smem:[#allocation11 + $0x40]] }
 0x16e   : > { %786 = vrot.lane.b32.xlu0 %v782_v16, %s2143_s12  ;;  %774 = vrot.lane.b32.xlu1 %v769_v17, %s2142_s8  ;;  %v952_v21 = vmul.f32 %v951_v13, %v2592_v5  ;;  %v939_v22 = vmul.f32 %v937_v6, %v2604_v15 }
 0x170   : > { %v343_v25 = vpop.permute.xlu1 %342  ;;  %v355_v26 = vpop.permute.xlu0 %354 }
 0x171   : > { %v360_v33 = vadd.f32 %v355_v26, %v346_v23  ;;  %v347_v40 = vadd.f32 %v343_v25, %v333_v32  ;;  %v965_v26 = vstv %s2595_s26  ;;  %v953_v32 = vmul.f32 %v951_v13, %v2604_v15  ;;  %s2688_s26 = sld [smem:[#allocation11 + $0x41]] }
 0x172   : > { %800 = vrot.lane.b32.xlu0 %v796_v27, %s2144_s17  ;;  %788 = vrot.lane.b32.xlu1 %v783_v28, %s2143_s12  ;;  %v471_v27 = vstv %s2599_s21  ;;  %v966_v31 = vmul.f32 %v965_v26, %v2592_v5  ;;  %s2697_s21 = sld [smem:[#allocation11 + $0x42]] }
 0x174   : > { %v357_v34 = vpop.permute.xlu1 %356  ;;  %v369_v35 = vpop.permute.xlu0 %368 }
 0x175   : > { %v374_v44 = vadd.f32 %v369_v35, %v360_v33  ;;  %v361_v46 = vadd.f32 %v357_v34, %v347_v40  ;;  %v472_v35 = vmul.f32 %v471_v27, %v2430_v58  ;;  %v993_v58 = vstv %s2613_s13  ;;  %s2708_s13 = sld [smem:[#allocation11 + $0x43]] }
 0x176   : > { %814 = vrot.lane.b32.xlu0 %v810_v37, %s2145_s29  ;;  %802 = vrot.lane.b32.xlu1 %v797_v39, %s2144_s17  ;;  %v979_v37 = vstv %s2606_s11  ;;  %s2701_s11 = sld [smem:[#allocation11 + $0x1c]] }
 0x177   : > { %v382_v47 = vadd.f32 %v380_v41, %v374_v44  ;;  %v980_v45 = vmul.f32 %v979_v37, %v2592_v5 }
 0x178   : > { %v371_v48 = vpop.permute.xlu1 %370  ;;  %v391_v49 = vpop.permute.xlu0 %390 }
 0x179   : > { %v375_v38 = vadd.f32 %v371_v48, %v361_v46  ;;  %v396_v7 = vadd.f32 %v391_v49, %v382_v47  ;;  %v967_v46 = vmul.f32 %v965_v26, %v2604_v15  ;;  %v473_v48 = vmul.f32 %v471_v27, %v2436_v63 }
 0x17a   : > { %828 = vrot.lane.b32.xlu0 %v824_v50, %s2146_s28  ;;  %816 = vrot.lane.b32.xlu1 %v811_v51, %s2145_s29 }
 0x17b   : > { %v383_v55 = vadd.f32 %v381_v52, %v375_v38  ;;  %v994_v52 = vmul.f32 %v993_v58, %v2592_v5  ;;  %v981_v38 = vmul.f32 %v979_v37, %v2604_v15 }
 0x17c   : > { %v393_v56 = vpop.permute.xlu1 %392  ;;  %v405_v57 = vpop.permute.xlu0 %404 }
 0x17d   : > { %v410_v12 = vadd.f32 %v405_v57, %v396_v7  ;;  %v397_v16 = vadd.f32 %v393_v56, %v383_v55  ;;  %v1008_v56 = vmul.f32 %v1007_v54, %v2592_v5  ;;  %v995_v57 = vmul.f32 %v993_v58, %v2604_v15 }
 0x17e   : > { %850 = vrot.lane.b32.xlu0 %v846_v59, %s2141_s1  ;;  %830 = vrot.lane.b32.xlu1 %v825_v61, %s2146_s28  ;;  %v2643_v59 = vld [vmem:[#allocation5 + $0x1] sm:$0xff]  ;;  %v1029_v61 = vstv %s2630_s9  ;;  %v1043_v7 = vstv %s2637_s5  ;;  %s2724_s9 = sld [smem:[#allocation11 + $0x45]]  ;;  %s2732_s5 = sld [smem:[#allocation11 + $0x47]] }
 0x17f   : > { %v1044_v13 = vmul.f32 %v1043_v7, %v2643_v59  ;;  %v1099_v58 = vstv %s2673_s30  ;;  %s2766_s30 = sld [smem:[#allocation11 + $0x4b]] }
 0x180   : > { %v407_v0 = vpop.permute.xlu1 %406  ;;  %v419_v1 = vpop.permute.xlu0 %418 }
 0x181   : > { %v424_v17 = vadd.f32 %v419_v1, %v410_v12  ;;  %v411_v24 = vadd.f32 %v407_v0, %v397_v16 }
 0x182   : > { %864 = vrot.lane.b32.xlu0 %v860_v2, %s2142_s8  ;;  %852 = vrot.lane.b32.xlu1 %v847_v3, %s2141_s1  ;;  %v1030_v2 = vmul.f32 %v1029_v61, %v2643_v59  ;;  %v1009_v3 = vmul.f32 %v1007_v54, %v2604_v15 }
 0x184   : > { %v421_v8 = vpop.permute.xlu1 %420  ;;  %v433_v9 = vpop.permute.xlu0 %432 }
 0x185   : > { %v438_v25 = vadd.f32 %v433_v9, %v424_v17  ;;  %v425_v28 = vadd.f32 %v421_v8, %v411_v24  ;;  %v2655_v8 = vld [vmem:[#allocation5 + $0x9] sm:$0xff] }
 0x186   : > { %942 = vrot.lane.b32.xlu0 %v938_v10, %s2141_s1  ;;  %866 = vrot.lane.b32.xlu1 %v861_v11, %s2142_s8  ;;  %v1031_v16 = vmul.f32 %v1029_v61, %v2655_v8 }
 0x188   : > { %v435_v18 = vpop.permute.xlu1 %434  ;;  %v447_v20 = vpop.permute.xlu0 %446 }
 0x189   : > { %v452_v29 = vadd.f32 %v447_v20, %v438_v25  ;;  %v439_v33 = vadd.f32 %v435_v18, %v425_v28  ;;  %v1057_v20 = vstv %s2646_s3  ;;  %v1045_v28 = vmul.f32 %v1043_v7, %v2655_v8  ;;  %s2739_s3 = sld [smem:[#allocation11 + $0x48]] }
 0x18a   : > { %956 = vrot.lane.b32.xlu0 %v952_v21, %s2142_s8  ;;  %944 = vrot.lane.b32.xlu1 %v939_v22, %s2141_s1  ;;  %v563_v21 = vstv %s2650_s6  ;;  %v1058_v27 = vmul.f32 %v1057_v20, %v2643_v59  ;;  %s2748_s6 = sld [smem:[#allocation11 + $0x49]] }
 0x18c   : > { %v449_v23 = vpop.permute.xlu1 %448  ;;  %v461_v30 = vpop.permute.xlu0 %460 }
 0x18d   : > { %v466_v34 = vadd.f32 %v461_v30, %v452_v29  ;;  %v453_v39 = vadd.f32 %v449_v23, %v439_v33  ;;  %v564_v30 = vmul.f32 %v563_v21, %v2458_v14  ;;  %v1085_v14 = vstv %s2664_s20  ;;  %s2759_s20 = sld [smem:[#allocation11 + $0x4a]] }
 0x18e   : > { %970 = vrot.lane.b32.xlu0 %v966_v31, %s2143_s12  ;;  %958 = vrot.lane.b32.xlu1 %v953_v32, %s2142_s8  ;;  %v1071_v31 = vstv %s2657_s27  ;;  %s2752_s27 = sld [smem:[#allocation11 + $0x23]] }
 0x18f   : > { %v474_v40 = vadd.f32 %v472_v35, %v466_v34  ;;  %v1072_v37 = vmul.f32 %v1071_v31, %v2643_v59 }
 0x190   : > { %v463_v41 = vpop.permute.xlu1 %462  ;;  %v483_v44 = vpop.permute.xlu0 %482 }
 0x191   : > { %v467_v47 = vadd.f32 %v463_v41, %v453_v39  ;;  %v488_v62 = vadd.f32 %v483_v44, %v474_v40  ;;  %v1059_v39 = vmul.f32 %v1057_v20, %v2655_v8  ;;  %v565_v41 = vmul.f32 %v563_v21, %v2464_v19 }
 0x192   : > { %984 = vrot.lane.b32.xlu0 %v980_v45, %s2144_s17  ;;  %972 = vrot.lane.b32.xlu1 %v967_v46, %s2143_s12 }
 0x193   : > { %v475_v49 = vadd.f32 %v473_v48, %v467_v47  ;;  %v1086_v47 = vmul.f32 %v1085_v14, %v2643_v59  ;;  %v1073_v48 = vmul.f32 %v1071_v31, %v2655_v8 }
 0x194   : > { %v485_v50 = vpop.permute.xlu1 %484  ;;  %v497_v51 = vpop.permute.xlu0 %496 }
 0x195   : > { %v502_v6 = vadd.f32 %v497_v51, %v488_v62  ;;  %v489_v9 = vadd.f32 %v485_v50, %v475_v49  ;;  %v1087_v50 = vmul.f32 %v1085_v14, %v2655_v8  ;;  %v1100_v51 = vmul.f32 %v1099_v58, %v2643_v59  ;;  %v2705_v62 = vld [vmem:[#allocation5 + $0xa] sm:$0xff] }
 0x196   : > { %998 = vrot.lane.b32.xlu0 %v994_v52, %s2145_s29  ;;  %986 = vrot.lane.b32.xlu1 %v981_v38, %s2144_s17  ;;  %v2694_v52 = vld [vmem:[#allocation5 + $0x2] sm:$0xff]  ;;  %v1121_v38 = vstv %s2681_s24  ;;  %v1191_v14 = vstv %s2724_s9  ;;  %s2775_s24 = sld [smem:[#allocation11 + $0x4c]]  ;;  %s2817_s9 = sld [smem:[#allocation11 + $0x52]] }
 0x197   : > { %v1123_v7 = vmul.f32 %v1121_v38, %v2705_v62 }
 0x198   : > { %v499_v63 = vpop.permute.xlu1 %498  ;;  %v511_v55 = vpop.permute.xlu0 %510 }
 0x199   : > { %v516_v10 = vadd.f32 %v511_v55, %v502_v6  ;;  %v503_v17 = vadd.f32 %v499_v63, %v489_v9 }
 0x19a   : > { %1012 = vrot.lane.b32.xlu0 %v1008_v56, %s2146_s28  ;;  %1000 = vrot.lane.b32.xlu1 %v995_v57, %s2145_s29  ;;  %v1101_v56 = vmul.f32 %v1099_v58, %v2655_v8  ;;  %v1122_v57 = vmul.f32 %v1121_v38, %v2694_v52 }
 0x19c   : > { %v513_v0 = vpop.permute.xlu1 %512  ;;  %v525_v1 = vpop.permute.xlu0 %524 }
 0x19d   : > { %v530_v18 = vadd.f32 %v525_v1, %v516_v10  ;;  %v517_v22 = vadd.f32 %v513_v0, %v503_v17  ;;  %v1135_v0 = vstv %s2688_s26  ;;  %s2783_s26 = sld [smem:[#allocation11 + $0x4e]] }
 0x19e   : > { %1034 = vrot.lane.b32.xlu0 %v1030_v2, %s2141_s1  ;;  %1014 = vrot.lane.b32.xlu1 %v1009_v3, %s2146_s28  ;;  %v1136_v9 = vmul.f32 %v1135_v0, %v2694_v52  ;;  %v1137_v21 = vmul.f32 %v1135_v0, %v2705_v62 }
 0x1a0   : > { %v527_v11 = vpop.permute.xlu1 %526  ;;  %v539_v12 = vpop.permute.xlu0 %538 }
 0x1a1   : > { %v544_v24 = vadd.f32 %v539_v12, %v530_v18  ;;  %v531_v29 = vadd.f32 %v527_v11, %v517_v22  ;;  %v1149_v12 = vstv %s2697_s21  ;;  %s2790_s21 = sld [smem:[#allocation11 + $0x4f]] }
 0x1a2   : > { %1048 = vrot.lane.b32.xlu0 %v1044_v13, %s2142_s8  ;;  %1036 = vrot.lane.b32.xlu1 %v1031_v16, %s2141_s1  ;;  %v655_v13 = vstv %s2701_s11  ;;  %v1150_v22 = vmul.f32 %v1149_v12, %v2694_v52  ;;  %v1151_v31 = vmul.f32 %v1149_v12, %v2705_v62  ;;  %s2799_s11 = sld [smem:[#allocation11 + $0x50]] }
 0x1a4   : > { %v541_v25 = vpop.permute.xlu1 %540  ;;  %v553_v26 = vpop.permute.xlu0 %552 }
 0x1a5   : > { %v558_v23 = vadd.f32 %v553_v26, %v544_v24  ;;  %v545_v32 = vadd.f32 %v541_v25, %v531_v29  ;;  %v656_v26 = vmul.f32 %v655_v13, %v2486_v36  ;;  %v1177_v36 = vstv %s2715_s25  ;;  %s2810_s25 = sld [smem:[#allocation11 + $0x51]] }
 0x1a6   : > { %1062 = vrot.lane.b32.xlu0 %v1058_v27, %s2143_s12  ;;  %1050 = vrot.lane.b32.xlu1 %v1045_v28, %s2142_s8  ;;  %v1163_v27 = vstv %s2708_s13  ;;  %s2803_s13 = sld [smem:[#allocation11 + $0x2a]] }
 0x1a7   : > { %v566_v33 = vadd.f32 %v564_v30, %v558_v23 }
 0x1a8   : > { %v555_v34 = vpop.permute.xlu1 %554  ;;  %v575_v35 = vpop.permute.xlu0 %574 }
 0x1a9   : > { %v559_v40 = vadd.f32 %v555_v34, %v545_v32  ;;  %v580_v54 = vadd.f32 %v575_v35, %v566_v33  ;;  %v1164_v32 = vmul.f32 %v1163_v27, %v2694_v52  ;;  %v657_v34 = vmul.f32 %v655_v13, %v2492_v42 }
 0x1aa   : > { %1076 = vrot.lane.b32.xlu0 %v1072_v37, %s2144_s17  ;;  %1064 = vrot.lane.b32.xlu1 %v1059_v39, %s2143_s12 }
 0x1ab   : > { %v567_v44 = vadd.f32 %v565_v41, %v559_v40  ;;  %v1165_v40 = vmul.f32 %v1163_v27, %v2705_v62  ;;  %v1178_v41 = vmul.f32 %v1177_v36, %v2694_v52 }
 0x1ac   : > { %v577_v45 = vpop.permute.xlu1 %576  ;;  %v589_v46 = vpop.permute.xlu0 %588 }
 0x1ad   : > { %v594_v61 = vadd.f32 %v589_v46, %v580_v54  ;;  %v581_v1 = vadd.f32 %v577_v45, %v567_v44  ;;  %v1179_v45 = vmul.f32 %v1177_v36, %v2705_v62  ;;  %v1192_v46 = vmul.f32 %v1191_v14, %v2694_v52  ;;  %v2756_v54 = vld [vmem:[#allocation5 + $0xb] sm:$0xff] }
 0x1ae   : > { %1090 = vrot.lane.b32.xlu0 %v1086_v47, %s2145_s29  ;;  %1078 = vrot.lane.b32.xlu1 %v1073_v48, %s2144_s17  ;;  %v2745_v47 = vld [vmem:[#allocation5 + $0x3] sm:$0xff]  ;;  %v1213_v48 = vstv %s2732_s5  ;;  %v1283_v36 = vstv %s2775_s24  ;;  %s2824_s5 = sld [smem:[#allocation11 + $0x31]] }
 0x1af   : > { %v1215_v0 = vmul.f32 %v1213_v48, %v2756_v54  ;;  %s2875_s24 = sld [smem:[#allocation11 + $0x59]] }
 0x1b0   : > { %v591_v19 = vpop.permute.xlu1 %590  ;;  %v603_v49 = vpop.permute.xlu0 %602 }
 0x1b1   : > { %v608_v2 = vadd.f32 %v603_v49, %v594_v61  ;;  %v595_v10 = vadd.f32 %v591_v19, %v581_v1 }
 0x1b2   : > { %1092 = vrot.lane.b32.xlu1 %v1087_v50, %s2145_s29  ;;  %1104 = vrot.lane.b32.xlu0 %v1100_v51, %s2146_s28  ;;  %v1193_v50 = vmul.f32 %v1191_v14, %v2705_v62  ;;  %v1214_v51 = vmul.f32 %v1213_v48, %v2745_v47 }
 0x1b4   : > { %v605_v63 = vpop.permute.xlu1 %604  ;;  %v617_v55 = vpop.permute.xlu0 %616 }
 0x1b5   : > { %v622_v11 = vadd.f32 %v617_v55, %v608_v2  ;;  %v609_v16 = vadd.f32 %v605_v63, %v595_v10  ;;  %v1227_v63 = vstv %s2739_s3  ;;  %s2828_s3 = sld [smem:[#allocation11 + $0x53]] }
 0x1b6   : > { %1106 = vrot.lane.b32.xlu1 %v1101_v56, %s2146_s28  ;;  %1126 = vrot.lane.b32.xlu0 %v1122_v57, %s2141_s1  ;;  %v1228_v1 = vmul.f32 %v1227_v63, %v2745_v47  ;;  %v1229_v13 = vmul.f32 %v1227_v63, %v2756_v54 }
 0x1b8   : > { %v619_v3 = vpop.permute.xlu1 %618  ;;  %v631_v6 = vpop.permute.xlu0 %630 }
 0x1b9   : > { %v636_v17 = vadd.f32 %v631_v6, %v622_v11  ;;  %v623_v24 = vadd.f32 %v619_v3, %v609_v16  ;;  %v1241_v6 = vstv %s2748_s6  ;;  %s2836_s6 = sld [smem:[#allocation11 + $0x55]] }
 0x1ba   : > { %1128 = vrot.lane.b32.xlu1 %v1123_v7, %s2141_s1  ;;  %1140 = vrot.lane.b32.xlu0 %v1136_v9, %s2142_s8  ;;  %v747_v7 = vstv %s2752_s27  ;;  %v1242_v16 = vmul.f32 %v1241_v6, %v2745_v47  ;;  %v1243_v27 = vmul.f32 %v1241_v6, %v2756_v54  ;;  %s2846_s27 = sld [smem:[#allocation11 + $0x56]] }
 0x1bc   : > { %v633_v18 = vpop.permute.xlu1 %632  ;;  %v645_v20 = vpop.permute.xlu0 %644 }
 0x1bd   : > { %v650_v25 = vadd.f32 %v645_v20, %v636_v17  ;;  %v637_v28 = vadd.f32 %v633_v18, %v623_v24  ;;  %v748_v20 = vmul.f32 %v747_v7, %v2520_v60  ;;  %v1269_v60 = vstv %s2766_s30  ;;  %s2868_s30 = sld [smem:[#allocation11 + $0x58]] }
 0x1be   : > { %1142 = vrot.lane.b32.xlu1 %v1137_v21, %s2142_s8  ;;  %1154 = vrot.lane.b32.xlu0 %v1150_v22, %s2143_s12  ;;  %v1255_v21 = vstv %s2759_s20  ;;  %s2858_s20 = sld [smem:[#allocation11 + $0x57]] }
 0x1bf   : > { %v658_v29 = vadd.f32 %v656_v26, %v650_v25 }
 0x1c0   : > { %v647_v23 = vpop.permute.xlu1 %646  ;;  %v667_v30 = vpop.permute.xlu0 %666 }
 0x1c1   : > { %v651_v33 = vadd.f32 %v647_v23, %v637_v28  ;;  %v672_v58 = vadd.f32 %v667_v30, %v658_v29  ;;  %v1256_v28 = vmul.f32 %v1255_v21, %v2745_v47  ;;  %v749_v23 = vmul.f32 %v747_v7, %v2530_v4 }
 0x1c2   : > { %1156 = vrot.lane.b32.xlu1 %v1151_v31, %s2143_s12  ;;  %1168 = vrot.lane.b32.xlu0 %v1164_v32, %s2144_s17 }
 0x1c3   : > { %v659_v35 = vadd.f32 %v657_v34, %v651_v33  ;;  %v1257_v33 = vmul.f32 %v1255_v21, %v2756_v54  ;;  %v1270_v34 = vmul.f32 %v1269_v60, %v2745_v47 }
 0x1c4   : > { %v669_v37 = vpop.permute.xlu1 %668  ;;  %v681_v39 = vpop.permute.xlu0 %680 }
 0x1c5   : > { %v686_v38 = vadd.f32 %v681_v39, %v672_v58  ;;  %v673_v55 = vadd.f32 %v669_v37, %v659_v35  ;;  %v1271_v37 = vmul.f32 %v1269_v60, %v2756_v54  ;;  %v1284_v39 = vmul.f32 %v1283_v36, %v2745_v47  ;;  %v2807_v58 = vld [vmem:[#allocation5 + $0xc] sm:$0xff] }
 0x1c6   : > { %1170 = vrot.lane.b32.xlu1 %v1165_v40, %s2144_s17  ;;  %1182 = vrot.lane.b32.xlu0 %v1178_v41, %s2145_s29  ;;  %v2796_v40 = vld [vmem:[#allocation5 + $0x4] sm:$0xff]  ;;  %v1305_v41 = vstv %s2783_s26  ;;  %s2879_s26 = sld [smem:[#allocation11 + $0x38]] }
 0x1c7   : > { %v1307_v63 = vmul.f32 %v1305_v41, %v2807_v58 }
 0x1c8   : > { %v683_v42 = vpop.permute.xlu1 %682  ;;  %v695_v44 = vpop.permute.xlu0 %694 }
 0x1c9   : > { %v700_v56 = vadd.f32 %v695_v44, %v686_v38  ;;  %v687_v2 = vadd.f32 %v683_v42, %v673_v55 }
 0x1ca   : > { %1184 = vrot.lane.b32.xlu1 %v1179_v45, %s2145_s29  ;;  %1196 = vrot.lane.b32.xlu0 %v1192_v46, %s2146_s28  ;;  %v1285_v45 = vmul.f32 %v1283_v36, %v2756_v54  ;;  %v1306_v46 = vmul.f32 %v1305_v41, %v2796_v40 }
 0x1cc   : > { %v697_v19 = vpop.permute.xlu1 %696  ;;  %v709_v49 = vpop.permute.xlu0 %708 }
 0x1cd   : > { %v714_v3 = vadd.f32 %v709_v49, %v700_v56  ;;  %v701_v9 = vadd.f32 %v697_v19, %v687_v2  ;;  %v1319_v19 = vstv %s2790_s21  ;;  %s2884_s21 = sld [smem:[#allocation11 + $0x5a]] }
 0x1ce   : > { %1198 = vrot.lane.b32.xlu1 %v1193_v50, %s2146_s28  ;;  %1218 = vrot.lane.b32.xlu0 %v1214_v51, %s2141_s1  ;;  %v1320_v55 = vmul.f32 %v1319_v19, %v2796_v40  ;;  %v1321_v7 = vmul.f32 %v1319_v19, %v2807_v58 }
 0x1d0   : > { %v711_v57 = vpop.permute.xlu1 %710  ;;  %v723_v61 = vpop.permute.xlu0 %722 }
 0x1d1   : > { %v728_v10 = vadd.f32 %v723_v61, %v714_v3  ;;  %v715_v17 = vadd.f32 %v711_v57, %v701_v9  ;;  %v1333_v61 = vstv %s2799_s11  ;;  %s2891_s11 = sld [smem:[#allocation11 + $0x5c]] }
 0x1d2   : > { %1220 = vrot.lane.b32.xlu1 %v1215_v0, %s2141_s1  ;;  %1232 = vrot.lane.b32.xlu0 %v1228_v1, %s2142_s8  ;;  %v839_v0 = vstv %s2803_s13  ;;  %v1334_v9 = vmul.f32 %v1333_v61, %v2796_v40  ;;  %v1335_v21 = vmul.f32 %v1333_v61, %v2807_v58  ;;  %s2900_s13 = sld [smem:[#allocation11 + $0x5d]] }
 0x1d4   : > { %v725_v11 = vpop.permute.xlu1 %724  ;;  %v737_v12 = vpop.permute.xlu0 %736 }
 0x1d5   : > { %v742_v18 = vadd.f32 %v737_v12, %v728_v10  ;;  %v729_v22 = vadd.f32 %v725_v11, %v715_v17  ;;  %v840_v12 = vmul.f32 %v839_v0, %v2574_v53 }
 0x1d6   : > { %1234 = vrot.lane.b32.xlu1 %v1229_v13, %s2142_s8  ;;  %1246 = vrot.lane.b32.xlu0 %v1242_v16, %s2143_s12  ;;  %v1347_v13 = vstv %s2810_s25  ;;  %s2910_s25 = sld [smem:[#allocation11 + $0x2d]] }
 0x1d7   : > { %v750_v24 = vadd.f32 %v748_v20, %v742_v18  ;;  %v1349_v60 = vmul.f32 %v1347_v13, %v2807_v58 }
 0x1d8   : > { %v739_v25 = vpop.permute.xlu1 %738  ;;  %v759_v26 = vpop.permute.xlu0 %758 }
 0x1d9   : > { %v743_v29 = vadd.f32 %v739_v25, %v729_v22  ;;  %v764_v14 = vadd.f32 %v759_v26, %v750_v24  ;;  %v1348_v22 = vmul.f32 %v1347_v13, %v2796_v40  ;;  %v841_v26 = vmul.f32 %v839_v0, %v2584_v43 }
 0x1da   : > { %1248 = vrot.lane.b32.xlu1 %v1243_v27, %s2143_s12  ;;  %1260 = vrot.lane.b32.xlu0 %v1256_v28, %s2144_s17  ;;  %v1361_v27 = vstv %s2817_s9  ;;  %v1425_v0 = vstv %s2858_s20  ;;  %s2919_s9 = sld [smem:[#allocation11 + $0x5e]] }
 0x1db   : > { %v751_v30 = vadd.f32 %v749_v23, %v743_v29  ;;  %s2975_s20 = sld [smem:[#allocation11 + $0x46]] }
 0x1dc   : > { %v761_v31 = vpop.permute.xlu1 %760  ;;  %v773_v32 = vpop.permute.xlu0 %772 }
 0x1dd   : > { %v778_v48 = vadd.f32 %v773_v32, %v764_v14  ;;  %v765_v49 = vadd.f32 %v761_v31, %v751_v30  ;;  %v1362_v30 = vmul.f32 %v1361_v27, %v2796_v40  ;;  %v931_v31 = vstv %s2824_s5  ;;  %s2926_s5 = sld [smem:[#allocation11 + $0x2e]] }
 0x1de   : > { %1262 = vrot.lane.b32.xlu1 %v1257_v33, %s2144_s17  ;;  %1274 = vrot.lane.b32.xlu0 %v1270_v34, %s2145_s29  ;;  %v1375_v34 = vstv %s2828_s3  ;;  %v932_v36 = vmul.f32 %v931_v31, %v2592_v5  ;;  %v933_v5 = vmul.f32 %v931_v31, %v2604_v15  ;;  %s2930_s3 = sld [smem:[#allocation11 + $0x3f]] }
 0x1e0   : > { %v775_v4 = vpop.permute.xlu1 %774  ;;  %v787_v35 = vpop.permute.xlu0 %786 }
 0x1e1   : > { %v792_v50 = vadd.f32 %v787_v35, %v778_v48  ;;  %v779_v56 = vadd.f32 %v775_v4, %v765_v49  ;;  %v1377_v48 = vmul.f32 %v1375_v34, %v2807_v58 }
 0x1e2   : > { %1276 = vrot.lane.b32.xlu1 %v1271_v37, %s2145_s29  ;;  %1288 = vrot.lane.b32.xlu0 %v1284_v39, %s2146_s28  ;;  %v1363_v37 = vmul.f32 %v1361_v27, %v2807_v58  ;;  %v1376_v39 = vmul.f32 %v1375_v34, %v2796_v40 }
 0x1e4   : > { %v789_v42 = vpop.permute.xlu1 %788  ;;  %v801_v44 = vpop.permute.xlu0 %800 }
 0x1e5   : > { %v806_v57 = vadd.f32 %v801_v44, %v792_v50  ;;  %v793_v1 = vadd.f32 %v789_v42, %v779_v56  ;;  %v2855_v42 = vld [vmem:[#allocation5 + $0x5] sm:$0xff]  ;;  %v1397_v44 = vstv %s2836_s6  ;;  %s2935_s6 = sld [smem:[#allocation11 + $0x5f]] }
 0x1e6   : > { %1290 = vrot.lane.b32.xlu1 %v1285_v45, %s2146_s28  ;;  %1310 = vrot.lane.b32.xlu0 %v1306_v46, %s2141_s1  ;;  %v1398_v19 = vmul.f32 %v1397_v44, %v2855_v42 }
 0x1e8   : > { %v803_v51 = vpop.permute.xlu1 %802  ;;  %v815_v38 = vpop.permute.xlu0 %814 }
 0x1e9   : > { %v820_v2 = vadd.f32 %v815_v38, %v806_v57  ;;  %v807_v10 = vadd.f32 %v803_v51, %v793_v1  ;;  %v2865_v51 = vld [vmem:[#allocation5 + $0xd] sm:$0xff]  ;;  %v1411_v38 = vstv %s2846_s27  ;;  %s2959_s27 = sld [smem:[#allocation11 + $0x30]] }
 0x1ea   : > { %1312 = vrot.lane.b32.xlu1 %v1307_v63, %s2141_s1  ;;  %1324 = vrot.lane.b32.xlu0 %v1320_v55, %s2142_s8  ;;  %v1399_v55 = vmul.f32 %v1397_v44, %v2865_v51  ;;  %v1412_v56 = vmul.f32 %v1411_v38, %v2855_v42  ;;  %v1427_v13 = vmul.f32 %v1425_v0, %v2865_v51 }
 0x1ec   : > { %v817_v3 = vpop.permute.xlu1 %816  ;;  %v829_v6 = vpop.permute.xlu0 %828 }
 0x1ed   : > { %v834_v11 = vadd.f32 %v829_v6, %v820_v2  ;;  %v821_v16 = vadd.f32 %v817_v3, %v807_v10  ;;  %v1413_v3 = vmul.f32 %v1411_v38, %v2865_v51  ;;  %v1426_v6 = vmul.f32 %v1425_v0, %v2855_v42 }
 0x1ee   : > { %1326 = vrot.lane.b32.xlu1 %v1321_v7, %s2142_s8  ;;  %1338 = vrot.lane.b32.xlu0 %v1334_v9, %s2143_s12  ;;  %v1439_v10 = vstv %s2868_s30  ;;  %s1574_s30 = sld [smem:[#allocation6]] }
 0x1ef   : > { %v842_v17 = vadd.f32 %v840_v12, %v834_v11 }
 0x1f0   : > { %v831_v18 = vpop.permute.xlu1 %830  ;;  %v851_v20 = vpop.permute.xlu0 %850 }
 0x1f1   : > { %v835_v24 = vadd.f32 %v831_v18, %v821_v16  ;;  %v856_v25 = vadd.f32 %v851_v20, %v842_v17  ;;  %v1440_v16 = vmul.f32 %v1439_v10, %v2855_v42  ;;  %v1453_v20 = vstv %s2875_s24 }
 0x1f2   : > { %1340 = vrot.lane.b32.xlu1 %v1335_v21, %s2143_s12  ;;  %1352 = vrot.lane.b32.xlu0 %v1348_v22, %s2144_s17  ;;  %v1023_v21 = vstv %s2879_s26 }
 0x1f3   : > { %v843_v28 = vadd.f32 %v841_v26, %v835_v24  ;;  %v1454_v26 = vmul.f32 %v1453_v20, %v2855_v42 }
 0x1f4   : > { %v853_v29 = vpop.permute.xlu1 %852  ;;  %v865_v23 = vpop.permute.xlu0 %864 }
 0x1f5   : > { %v857_v32 = vadd.f32 %v853_v29, %v843_v28  ;;  %v2843_v33 = vadd.f32 %v865_v23, %v856_v25  ;;  %v1441_v25 = vmul.f32 %v1439_v10, %v2865_v51  ;;  %v1024_v28 = vmul.f32 %v1023_v21, %v2643_v59 }
 0x1f6   : > { %1354 = vrot.lane.b32.xlu1 %v1349_v60, %s2144_s17  ;;  %1366 = vrot.lane.b32.xlu0 %v1362_v30, %s2145_s29  ;;  %v1467_v23 = vstv %s2884_s21 }
 0x1f7   : > { %v1468_v34 = vmul.f32 %v1467_v23, %v2855_v42 }
 0x1f8   : > { %v867_v4 = vpop.permute.xlu1 %866  ;;  %v943_v35 = vpop.permute.xlu0 %942 }
 0x1f9   : > { %v2853_v41 = vadd.f32 %v867_v4, %v857_v32  ;;  %v948_v14 = vadd.f32 %v943_v35, %v932_v36  ;;  %v1455_v32 = vmul.f32 %v1453_v20, %v2865_v51  ;;  %v1025_v36 = vmul.f32 %v1023_v21, %v2655_v8  ;;  %v2907_v35 = vld [vmem:[#allocation5 + $0x6] sm:$0xff] }
 0x1fa   : > { %1368 = vrot.lane.b32.xlu1 %v1363_v37, %s2145_s29  ;;  %1380 = vrot.lane.b32.xlu0 %v1376_v39, %s2146_s28  ;;  %v1489_v37 = vstv %s2891_s11 }
 0x1fb   : > { %v1490_v8 = vmul.f32 %v1489_v37, %v2907_v35 }
 0x1fc   : > { %v945_v45 = vpop.permute.xlu1 %944  ;;  %v957_v46 = vpop.permute.xlu0 %956 }
 0x1fd   : > { %v949_v49 = vadd.f32 %v945_v45, %v933_v5  ;;  %v962_v50 = vadd.f32 %v957_v46, %v948_v14  ;;  %v1469_v5 = vmul.f32 %v1467_v23, %v2865_v51 }
 0x1fe   : > { %1382 = vrot.lane.b32.xlu1 %v1377_v48, %s2146_s28  ;;  %1402 = vrot.lane.b32.xlu0 %v1398_v19, %s2141_s1  ;;  %v2916_v48 = vld [vmem:[#allocation5 + $0xe] sm:$0xff]  ;;  %v1503_v19 = vstv %s2900_s13 }
 0x1ff   : > { %v1491_v38 = vmul.f32 %v1489_v37, %v2916_v48  ;;  %v1505_v0 = vmul.f32 %v1503_v19, %v2916_v48 }
 0x200   : > { %v959_v63 = vpop.permute.xlu1 %958  ;;  %v971_v15 = vpop.permute.xlu0 %970 }
 0x201   : > { %v963_v57 = vadd.f32 %v959_v63, %v949_v49  ;;  %v976_v61 = vadd.f32 %v971_v15, %v962_v50  ;;  %v1504_v63 = vmul.f32 %v1503_v19, %v2907_v35 }
 0x202   : > { %1404 = vrot.lane.b32.xlu1 %v1399_v55, %s2141_s1  ;;  %1416 = vrot.lane.b32.xlu0 %v1412_v56, %s2142_s8  ;;  %v873_v56 = vstv %s2910_s25 }
 0x203   : > { %v875_v10 = vmul.f32 %v873_v56, %v2584_v43 }
 0x204   : > { %v973_v1 = vpop.permute.xlu1 %972  ;;  %v985_v2 = vpop.permute.xlu0 %984 }
 0x205   : > { %v977_v7 = vadd.f32 %v973_v1, %v963_v57  ;;  %v990_v9 = vadd.f32 %v985_v2, %v976_v61  ;;  %v874_v1 = vmul.f32 %v873_v56, %v2574_v53 }
 0x206   : > { %1418 = vrot.lane.b32.xlu1 %v1413_v3, %s2142_s8  ;;  %1430 = vrot.lane.b32.xlu0 %v1426_v6, %s2143_s12  ;;  %v1517_v6 = vstv %s2919_s9 }
 0x207   : > { %v1519_v21 = vmul.f32 %v1517_v6, %v2916_v48 }
 0x208   : > { %v987_v11 = vpop.permute.xlu1 %986  ;;  %v999_v12 = vpop.permute.xlu0 %998 }
 0x209   : > { %v991_v17 = vadd.f32 %v987_v11, %v977_v7  ;;  %v1004_v18 = vadd.f32 %v999_v12, %v990_v9  ;;  %v1518_v11 = vmul.f32 %v1517_v6, %v2907_v35 }
 0x20a   : > { %1432 = vrot.lane.b32.xlu1 %v1427_v13, %s2143_s12  ;;  %1444 = vrot.lane.b32.xlu0 %v1440_v16, %s2144_s17  ;;  %v887_v16 = vstv %s2926_s5 }
 0x20c   : > { %v1001_v22 = vpop.permute.xlu1 %1000  ;;  %v1013_v24 = vpop.permute.xlu0 %1012 }
 0x20d   : > { %v1005_v27 = vadd.f32 %v1001_v22, %v991_v17  ;;  %v1018_v29 = vadd.f32 %v1013_v24, %v1004_v18  ;;  %v1115_v17 = vstv %s2930_s3  ;;  %v888_v22 = vmul.f32 %v887_v16, %v2574_v53 }
 0x20e   : > { %1446 = vrot.lane.b32.xlu1 %v1441_v25, %s2144_s17  ;;  %1458 = vrot.lane.b32.xlu0 %v1454_v26, %s2145_s29  ;;  %v1116_v26 = vmul.f32 %v1115_v17, %v2694_v52 }
 0x20f   : > { %v1026_v60 = vadd.f32 %v1024_v28, %v1018_v29 }
 0x210   : > { %v1015_v30 = vpop.permute.xlu1 %1014  ;;  %v1035_v31 = vpop.permute.xlu0 %1034 }
 0x211   : > { %v1019_v4 = vadd.f32 %v1015_v30, %v1005_v27  ;;  %v1040_v59 = vadd.f32 %v1035_v31, %v1026_v60  ;;  %v1531_v27 = vstv %s2935_s6  ;;  %v889_v60 = vmul.f32 %v887_v16, %v2584_v43 }
 0x212   : > { %1460 = vrot.lane.b32.xlu1 %v1455_v32, %s2145_s29  ;;  %1472 = vrot.lane.b32.xlu0 %v1468_v34, %s2146_s28  ;;  %v1532_v30 = vmul.f32 %v1531_v27, %v2907_v35  ;;  %v1117_v34 = vmul.f32 %v1115_v17, %v2705_v62  ;;  %v1533_v37 = vmul.f32 %v1531_v27, %v2916_v48 }
 0x213   : > { %v1027_v39 = vadd.f32 %v1025_v36, %v1019_v4 }
 0x214   : > { %v1037_v14 = vpop.permute.xlu1 %1036  ;;  %v1049_v44 = vpop.permute.xlu0 %1048 }
 0x215   : > { %v1041_v45 = vadd.f32 %v1037_v14, %v1027_v39  ;;  %v1054_v46 = vadd.f32 %v1049_v44, %v1040_v59 }
 0x216   : > { %1474 = vrot.lane.b32.xlu1 %v1469_v5, %s2146_s28  ;;  %1494 = vrot.lane.b32.xlu0 %v1490_v8, %s2141_s1 }
 0x218   : > { %v1051_v49 = vpop.permute.xlu1 %1050  ;;  %v1063_v50 = vpop.permute.xlu0 %1062 }
 0x219   : > { %v1055_v15 = vadd.f32 %v1051_v49, %v1041_v45  ;;  %v1068_v55 = vadd.f32 %v1063_v50, %v1054_v46  ;;  %v915_v49 = vstv %s2959_s27 }
 0x21a   : > { %1496 = vrot.lane.b32.xlu1 %v1491_v38, %s2141_s1  ;;  %1508 = vrot.lane.b32.xlu0 %v1504_v63, %s2142_s8  ;;  %s2942_s1 = sld [smem:[#allocation11 + $0x2f]]  ;;  %v1960_v63 = vld [vmem:[#allocation4 + $0x6] sm:$0xff] }
 0x21c   : > { %v1065_v57 = vpop.permute.xlu1 %1064  ;;  %v1077_v61 = vpop.permute.xlu0 %1076 }
 0x21d   : > { %v1069_v2 = vadd.f32 %v1065_v57, %v1055_v15  ;;  %v1082_v3 = vadd.f32 %v1077_v61, %v1068_v55  ;;  %v916_v15 = vmul.f32 %v1960_v63, %v915_v49  ;;  %v1961_v61 = vld [vmem:[#allocation4 + $0xe] sm:$0xff] }
 0x21e   : > { %1510 = vrot.lane.b32.xlu1 %v1505_v0, %s2142_s8  ;;  %878 = vrot.lane.b32.xlu0 %v874_v1, %s2143_s12  ;;  %s2951_s8 = sld [smem:[#allocation11 + $0x60]]  ;;  %v917_v0 = vmul.f32 %v1961_v61, %v915_v49 }
 0x220   : > { %v1079_v7 = vpop.permute.xlu1 %1078  ;;  %v1091_v9 = vpop.permute.xlu0 %1090  ;;  %v901_v52 = vstv %s2942_s1 }
 0x221   : > { %v1083_v12 = vadd.f32 %v1079_v7, %v1069_v2  ;;  %v1096_v13 = vadd.f32 %v1091_v9, %v1082_v3  ;;  %v902_v39 = vmul.f32 %v901_v52, %v2574_v53  ;;  %v903_v45 = vmul.f32 %v901_v52, %v2584_v43 }
 0x222   : > { %880 = vrot.lane.b32.xlu1 %v875_v10, %s2143_s12  ;;  %1522 = vrot.lane.b32.xlu0 %v1518_v11, %s2143_s12  ;;  %v1207_v3 = vstv %s2975_s20 }
 0x223   : > { %v1208_v16 = vmul.f32 %v1207_v3, %v2745_v47 }
 0x224   : > { %v1093_v18 = vpop.permute.xlu1 %1092  ;;  %v1105_v20 = vpop.permute.xlu0 %1104  ;;  %v1545_v5 = vstv %s2951_s8 }
 0x225   : > { %v1097_v24 = vadd.f32 %v1093_v18, %v1083_v12  ;;  %v1110_v25 = vadd.f32 %v1105_v20, %v1096_v13  ;;  %v1546_v46 = vmul.f32 %v1545_v5, %v2907_v35  ;;  %v1547_v38 = vmul.f32 %v1545_v5, %v2916_v48 }
 0x226   : > { %1524 = vrot.lane.b32.xlu1 %v1519_v21, %s2143_s12  ;;  %892 = vrot.lane.b32.xlu0 %v888_v22, %s2144_s17  ;;  %s2966_s12 = sld [smem:[#allocation11 + $0x61]] }
 0x227   : > { %v1118_v28 = vadd.f32 %v1116_v26, %v1110_v25 }
 0x228   : > { %v1107_v29 = vpop.permute.xlu1 %1106  ;;  %v1127_v23 = vpop.permute.xlu0 %1126 }
 0x229   : > { %v1111_v31 = vadd.f32 %v1107_v29, %v1097_v24  ;;  %v1132_v32 = vadd.f32 %v1127_v23, %v1118_v28  ;;  %v1209_v24 = vmul.f32 %v1207_v3, %v2756_v54 }
 0x22a   : > { %894 = vrot.lane.b32.xlu1 %v889_v60, %s2144_s17  ;;  %1536 = vrot.lane.b32.xlu0 %v1532_v30, %s2144_s17 }
 0x22b   : > { %v1119_v36 = vadd.f32 %v1117_v34, %v1111_v31 }
 0x22c   : > { %v1129_v4 = vpop.permute.xlu1 %1128  ;;  %v1141_v59 = vpop.permute.xlu0 %1140  ;;  %v1559_v55 = vstv %s2966_s12 }
 0x22d   : > { %v1133_v14 = vadd.f32 %v1129_v4, %v1119_v36  ;;  %v1146_v44 = vadd.f32 %v1141_v59, %v1132_v32  ;;  %v1560_v1 = vmul.f32 %v1559_v55, %v2907_v35  ;;  %v1561_v11 = vmul.f32 %v1559_v55, %v2916_v48 }
 0x22e   : > { %1538 = vrot.lane.b32.xlu1 %v1533_v37, %s2144_s17  ;;  %906 = vrot.lane.b32.xlu0 %v902_v39, %s2145_s29  ;;  %s1796_s17 = sld [smem:[#allocation11 + $0x4d]] }
 0x230   : > { %v1143_v62 = vpop.permute.xlu1 %1142  ;;  %v1155_v8 = vpop.permute.xlu0 %1154 }
 0x231   : > { %v1147_v19 = vadd.f32 %v1143_v62, %v1133_v14  ;;  %v1160_v43 = vadd.f32 %v1155_v8, %v1146_v44 }
 0x232   : > { %908 = vrot.lane.b32.xlu1 %v903_v45, %s2145_s29  ;;  %1550 = vrot.lane.b32.xlu0 %v1546_v46, %s2145_s29 }
 0x234   : > { %v1157_v53 = vpop.permute.xlu1 %1156  ;;  %v1169_v50 = vpop.permute.xlu0 %1168  ;;  %v1299_v59 = vstv %s1796_s17 }
 0x235   : > { %v1174_v2 = vadd.f32 %v1169_v50, %v1160_v43  ;;  %v1161_v6 = vadd.f32 %v1157_v53, %v1147_v19  ;;  %v1300_v62 = vmul.f32 %v1299_v59, %v2796_v40  ;;  %v1301_v53 = vmul.f32 %v1299_v59, %v2807_v58 }
 0x236   : > { %1552 = vrot.lane.b32.xlu1 %v1547_v38, %s2145_s29  ;;  %920 = vrot.lane.b32.xlu0 %v916_v15, %s2146_s28  ;;  %s1803_s29 = sld [smem:[#allocation11 + $0x54]] }
 0x238   : > { %v1171_v56 = vpop.permute.xlu1 %1170  ;;  %v1183_v57 = vpop.permute.xlu0 %1182 }
 0x239   : > { %v1188_v7 = vadd.f32 %v1183_v57, %v1174_v2  ;;  %v1175_v12 = vadd.f32 %v1171_v56, %v1161_v6 }
 0x23a   : > { %922 = vrot.lane.b32.xlu1 %v917_v0, %s2146_s28  ;;  %1564 = vrot.lane.b32.xlu0 %v1560_v1, %s2146_s28 }
 0x23c   : > { %v1185_v9 = vpop.permute.xlu1 %1184  ;;  %v1197_v10 = vpop.permute.xlu0 %1196 }
 0x23d   : > { %v1202_v13 = vadd.f32 %v1197_v10, %v1188_v7  ;;  %v1189_v17 = vadd.f32 %v1185_v9, %v1175_v12  ;;  %v1391_v7 = vstv %s1803_s29 }
 0x23e   : > { %1566 = vrot.lane.b32.xlu1 %v1561_v11, %s2146_s28  ;;  %s1810_s28 = sld [smem:[#allocation11 + $0x5b]] }
 0x23f   : > { %v1210_v18 = vadd.f32 %v1208_v16, %v1202_v13  ;;  %v1392_v16 = vmul.f32 %v1391_v7, %v2855_v42 }
 0x240   : > { %v1199_v20 = vpop.permute.xlu1 %1198  ;;  %v1219_v21 = vpop.permute.xlu0 %1218 }
 0x241   : > { %v1203_v22 = vadd.f32 %v1199_v20, %v1189_v17  ;;  %v1224_v23 = vadd.f32 %v1219_v21, %v1210_v18 }
 0x243   : > { %v1211_v25 = vadd.f32 %v1209_v24, %v1203_v22  ;;  %v1393_v24 = vmul.f32 %v1391_v7, %v2865_v51 }
 0x244   : > { %v1221_v26 = vpop.permute.xlu1 %1220  ;;  %v1233_v27 = vpop.permute.xlu0 %1232 }
 0x245   : > { %v1238_v31 = vadd.f32 %v1233_v27, %v1224_v23  ;;  %v1225_v47 = vadd.f32 %v1221_v26, %v1211_v25 }
 0x248   : > { %v1235_v28 = vpop.permute.xlu1 %1234  ;;  %v1247_v29 = vpop.permute.xlu0 %1246 }
 0x249   : > { %v1252_v32 = vadd.f32 %v1247_v29, %v1238_v31  ;;  %v1239_v36 = vadd.f32 %v1235_v28, %v1225_v47 }
 0x24c   : > { %v1249_v60 = vpop.permute.xlu1 %1248  ;;  %v1261_v30 = vpop.permute.xlu0 %1260 }
 0x24d   : > { %v1266_v4 = vadd.f32 %v1261_v30, %v1252_v32  ;;  %v1253_v37 = vadd.f32 %v1249_v60, %v1239_v36 }
 0x250   : > { %v1263_v34 = vpop.permute.xlu1 %1262  ;;  %v1275_v52 = vpop.permute.xlu0 %1274 }
 0x251   : > { %v1280_v39 = vadd.f32 %v1275_v52, %v1266_v4  ;;  %v1267_v44 = vadd.f32 %v1263_v34, %v1253_v37  ;;  %v1483_v4 = vstv %s1810_s28 }
 0x254   : > { %v1277_v54 = vpop.permute.xlu1 %1276  ;;  %v1289_v14 = vpop.permute.xlu0 %1288 }
 0x255   : > { %v1294_v5 = vadd.f32 %v1289_v14, %v1280_v39  ;;  %v1281_v8 = vadd.f32 %v1277_v54, %v1267_v44  ;;  %v1484_v44 = vmul.f32 %v1483_v4, %v2907_v35 }
 0x257   : > { %v1302_v45 = vadd.f32 %v1300_v62, %v1294_v5 }
 0x258   : > { %v1291_v46 = vpop.permute.xlu1 %1290  ;;  %v1311_v19 = vpop.permute.xlu0 %1310 }
 0x259   : > { %v1295_v49 = vadd.f32 %v1291_v46, %v1281_v8  ;;  %v1316_v43 = vadd.f32 %v1311_v19, %v1302_v45  ;;  %v1485_v19 = vmul.f32 %v1483_v4, %v2916_v48 }
 0x25b   : > { %v1303_v50 = vadd.f32 %v1301_v53, %v1295_v49 }
 0x25c   : > { %v1313_v38 = vpop.permute.xlu1 %1312  ;;  %v1325_v63 = vpop.permute.xlu0 %1324 }
 0x25d   : > { %v1330_v61 = vadd.f32 %v1325_v63, %v1316_v43  ;;  %v1317_v0 = vadd.f32 %v1313_v38, %v1303_v50 }
 0x260   : > { %v1327_v15 = vpop.permute.xlu1 %1326  ;;  %v1339_v55 = vpop.permute.xlu0 %1338 }
 0x261   : > { %v1344_v1 = vadd.f32 %v1339_v55, %v1330_v61  ;;  %v1331_v3 = vadd.f32 %v1327_v15, %v1317_v0 }
 0x264   : > { %v1341_v56 = vpop.permute.xlu1 %1340  ;;  %v1353_v57 = vpop.permute.xlu0 %1352 }
 0x265   : > { %v1358_v6 = vadd.f32 %v1353_v57, %v1344_v1  ;;  %v1345_v9 = vadd.f32 %v1341_v56, %v1331_v3 }
 0x268   : > { %v1355_v40 = vpop.permute.xlu1 %1354  ;;  %v1367_v2 = vpop.permute.xlu0 %1366 }
 0x269   : > { %v1372_v10 = vadd.f32 %v1367_v2, %v1358_v6  ;;  %v1359_v12 = vadd.f32 %v1355_v40, %v1345_v9 }
 0x26c   : > { %v1369_v58 = vpop.permute.xlu1 %1368  ;;  %v1381_v11 = vpop.permute.xlu0 %1380 }
 0x26d   : > { %v1386_v13 = vadd.f32 %v1381_v11, %v1372_v10  ;;  %v1373_v17 = vadd.f32 %v1369_v58, %v1359_v12 }
 0x26f   : > { %v1394_v18 = vadd.f32 %v1392_v16, %v1386_v13 }
 0x270   : > { %v1383_v20 = vpop.permute.xlu1 %1382  ;;  %v1403_v21 = vpop.permute.xlu0 %1402 }
 0x271   : > { %v1387_v22 = vadd.f32 %v1383_v20, %v1373_v17  ;;  %v1408_v23 = vadd.f32 %v1403_v21, %v1394_v18 }
 0x273   : > { %v1395_v25 = vadd.f32 %v1393_v24, %v1387_v22 }
 0x274   : > { %v1405_v26 = vpop.permute.xlu1 %1404  ;;  %v1417_v27 = vpop.permute.xlu0 %1416 }
 0x275   : > { %v1422_v31 = vadd.f32 %v1417_v27, %v1408_v23  ;;  %v1409_v47 = vadd.f32 %v1405_v26, %v1395_v25  ;;  %v1575_v27 = vstv %s1574_s30 }
 0x278   : > { %v1419_v28 = vpop.permute.xlu1 %1418  ;;  %v1431_v29 = vpop.permute.xlu0 %1430 }
 0x279   : > { %v1436_v32 = vadd.f32 %v1431_v29, %v1422_v31  ;;  %v1423_v52 = vadd.f32 %v1419_v28, %v1409_v47 }
 0x27c   : > { %v1433_v60 = vpop.permute.xlu1 %1432  ;;  %v1445_v30 = vpop.permute.xlu0 %1444 }
 0x27d   : > { %v1450_v36 = vadd.f32 %v1445_v30, %v1436_v32  ;;  %v1437_v59 = vadd.f32 %v1433_v60, %v1423_v52 }
 0x280   : > { %v1447_v42 = vpop.permute.xlu1 %1446  ;;  %v1459_v34 = vpop.permute.xlu0 %1458 }
 0x281   : > { %v1464_v37 = vadd.f32 %v1459_v34, %v1450_v36  ;;  %v1451_v54 = vadd.f32 %v1447_v42, %v1437_v59 }
 0x284   : > { %v1461_v51 = vpop.permute.xlu1 %1460  ;;  %v1473_v39 = vpop.permute.xlu0 %1472 }
 0x285   : > { %v1478_v14 = vadd.f32 %v1473_v39, %v1464_v37  ;;  %v1465_v5 = vadd.f32 %v1461_v51, %v1451_v54 }
 0x287   : > { %v1486_v62 = vadd.f32 %v1484_v44, %v1478_v14 }
 0x288   : > { %v1475_v8 = vpop.permute.xlu1 %1474  ;;  %v1495_v45 = vpop.permute.xlu0 %1494 }
 0x289   : > { %v1479_v46 = vadd.f32 %v1475_v8, %v1465_v5  ;;  %v1500_v1 = vadd.f32 %v1495_v45, %v1486_v62 }
 0x28b   : > { %v1487_v49 = vadd.f32 %v1485_v19, %v1479_v46 }
 0x28c   : > { %v1497_v53 = vpop.permute.xlu1 %1496  ;;  %v1509_v50 = vpop.permute.xlu0 %1508 }
 0x28d   : > { %v1514_v3 = vadd.f32 %v1509_v50, %v1500_v1  ;;  %v1501_v6 = vadd.f32 %v1497_v53, %v1487_v49 }
 0x290   : > { %v1511_v38 = vpop.permute.xlu1 %1510  ;;  %v879_v63 = vpop.permute.xlu0 %878 }
 0x291   : > { %v884_v48 = vadd.f32 %v879_v63, %v2843_v33  ;;  %v1515_v58 = vadd.f32 %v1511_v38, %v1501_v6 }
 0x294   : > { %v881_v15 = vpop.permute.xlu1 %880  ;;  %v1523_v55 = vpop.permute.xlu0 %1522 }
 0x295   : > { %v1528_v7 = vadd.f32 %v1523_v55, %v1514_v3  ;;  %v885_v13 = vadd.f32 %v881_v15, %v2853_v41 }
 0x298   : > { %v1525_v43 = vpop.permute.xlu1 %1524  ;;  %v893_v56 = vpop.permute.xlu0 %892 }
 0x299   : > { %v898_v11 = vadd.f32 %v893_v56, %v884_v48  ;;  %v1529_v16 = vadd.f32 %v1525_v43, %v1515_v58 }
 0x29c   : > { %v895_v57 = vpop.permute.xlu1 %894  ;;  %v1537_v61 = vpop.permute.xlu0 %1536 }
 0x29d   : > { %v1542_v12 = vadd.f32 %v1537_v61, %v1528_v7  ;;  %v899_v22 = vadd.f32 %v895_v57, %v885_v13 }
 0x2a0   : > { %v1539_v0 = vpop.permute.xlu1 %1538  ;;  %v907_v35 = vpop.permute.xlu0 %906 }
 0x2a1   : > { %v912_v17 = vadd.f32 %v907_v35, %v898_v11  ;;  %v1543_v24 = vadd.f32 %v1539_v0, %v1529_v16 }
 0x2a4   : > { %v909_v40 = vpop.permute.xlu1 %908  ;;  %v1551_v2 = vpop.permute.xlu0 %1550 }
 0x2a5   : > { %v1556_v18 = vadd.f32 %v1551_v2, %v1542_v12  ;;  %v913_v28 = vadd.f32 %v909_v40, %v899_v22 }
 0x2a8   : > { %v1553_v9 = vpop.permute.xlu1 %1552  ;;  %v921_v10 = vpop.permute.xlu0 %920 }
 0x2a9   : > { %v926_v25 = vadd.f32 %v921_v10, %v912_v17  ;;  %v1557_v33 = vadd.f32 %v1553_v9, %v1543_v24 }
 0x2ac   : > { %v923_v20 = vpop.permute.xlu1 %922  ;;  %v1565_v21 = vpop.permute.xlu0 %1564 }
 0x2ad   : > { %v1570_v26 = vadd.f32 %v1565_v21, %v1556_v18  ;;  %v927_v60 = vadd.f32 %v923_v20, %v913_v28 }
 0x2af   : > { %v1572_v29 = vadd.f32 %v1570_v26, %v926_v25 }
 0x2b0   : > { %v1567_v23 = vpop.permute.xlu1 %1566 }
 0x2b1   : > { %v1576_v30 = vadd.f32 %v1575_v27, %v1572_v29  ;;  %v1571_v31 = vadd.f32 %v1567_v23, %v1557_v33 }
 0x2b3   : > { %v1817_v41 = vmul.f32 -1.442695, %v1576_v30  ;;  %v1573_v47 = vadd.f32 %v1571_v31, %v927_v60 }
 0x2b5   : > { %1952 = vpow2.f32 %v1817_v41  ;;  %v1577_v32 = vadd.f32 %v1575_v27, %v1573_v47 }
 0x2b7   : > { %v1818_v42 = vmul.f32 -1.442695, %v1577_v32 }
 0x2b9   : > { %1954 = vpow2.f32 %v1818_v42 }
 0x2bf   : > { %v1953_v34 = vpop.eup %1952 }
 0x2c0   : > { %v1584_v52 = vadd.f32 1.0, %v1953_v34 }
 0x2c2   : > { %1956 = vrcp.f32 %v1584_v52 }
 0x2c3   : > { %v1955_v36 = vpop.eup %1954 }
 0x2c4   : > { %v1585_v4 = vadd.f32 1.0, %v1955_v36 }
 0x2c6   : > { %1958 = vrcp.f32 %v1585_v4 }
 0x2cc   : > { %v1957_v59 = vpop.eup %1956 }
 0x2cd   : > { %1590 = vst.msk [vmem:[%s2370_s7] sm:$0xff] %vm237_vm1, %v1957_v59 }
 0x2d0   : > { %v1959_v37 = vpop.eup %1958 }
 0x2d1   : > { %1591 = vst.msk [vmem:[%s2370_s7 + $0x8] sm:$0xff] %vm237_vm1, %v1959_v37 }
 0x2d2 PF: > { %s3111_s24 = sld [smem:[#allocation19_spill]]  ;;  %s1824_s26 = sshll.u32 %s2119_s2, 8 }
 0x2d3   : > { %s3112_s13 = sld [smem:[#allocation23_spill]]  ;;  %s1606_s9 = sshll.u32 %s2370_s7, 4  ;;  %s3008_s9 = int_to_ptr.vmem [resolvable:$true] %s1606_s9 }
 0x2d4   : > { %s3012_s5 = scalar_lea.sflag [#allocation9], %s215_s4  ;;  %s2005_s3 = scalar_lea.vmem %s3008_s9, 256 }
 0x2d5   : > { %p2006_p0 = scmp.ne.s32.totalorder %s3008_s9, %s2005_s3  ;;  %s2147_s2 = smov [#allocation12]  }
 0x2d6   : > { %s2009_s6 = sshll.u32 %s2147_s2, 4  ;;  %s2010_s6 = int_to_ptr.vmem [resolvable:$false] %s2009_s6 }
 0x2d7   : > { %s2011_s1 = scalar_lea.vmem %s2010_s6, 512  ;;  %p2012_p8 = scmp.lt.s32.totalorder %s3008_s9, %s2010_s6 }
 0x2d8   : > { %p3113_p9 = scmp.ne.s32.totalorder %s3111_s24, 0  ;;  %p2013_p7 = scmp.lt.s32.totalorder %s2011_s1, %s2005_s3 }
 0x2d9   : > { %s3005_s25 = scalar_lea.hbm %s3112_s13, %s1824_s26 }
 0x2da   : > { %p2007_p11 = pnand %p2006_p0, %p3113_p9  ;;  %p2014_p4 = por %p2013_p7, %p2012_p8 }
 0x2dc   : > { %p2008_p5 = pneg %p2007_p11 }
 0x2de   : > { %p2015_p13 = pnand %p2014_p4, %p2008_p5 }
 0x2e0   : > { %2018 = shalt.err (!%p2015_p13)
}
 0x2e1   : > { %s2019_s4 = scalar_lea.hbm %s3005_s25, 256  ;;  %s2023_s27 = scalar_lea.hbm %s3112_s13, 512 }
 0x2e2   : > { %p2020_p1 = scmp.ne.s32.totalorder %s3005_s25, %s2019_s4  ;;  %p2024_p10 = scmp.lt.u32.totalorder %s3005_s25, %s3112_s13 }
 0x2e3   : > { %p2025_p6 = scmp.lt.u32.totalorder %s2023_s27, %s2019_s4  ;;  %p2027_p0 = scmp.lt.u32.totalorder %s2019_s4, %s3005_s25 }
 0x2e4   : > { %p2021_p2 = pnand %p2020_p1, %p3113_p9 }
 0x2e5   : > { %p2026_p12 = por %p2025_p6, %p2024_p10 }
 0x2e6   : > { %p2022_p3 = pneg %p2021_p2 }
 0x2e7   : > { %p2028_p11 = por %p2027_p0, %p2026_p12 }
 0x2e9   : > { %p2029_p5 = pnand %p2028_p11, %p2022_p3 }
 0x2eb   : > { %2032 = shalt.err (!%p2029_p5)
}
 0x2ec   : > { %s2148_s17 = smov 128   ;;  %s2149_s29 = smov 8  }
 0x2ed   : > { %1831 = dma.vmem_to_hbm [thread:$0]  (%p3113_p9), %s3008_s9, 256, %s3005_s25, %s3012_s5, %s2148_s17, %s2148_s17, %s2149_s29  }
 0x2ee PF: > { %s3114_s28 = sld [smem:[#allocation18_spill]]  ;;  %s3115_s30 = sld [smem:[#allocation16_spill]] }
 0x2ef   : > { %s3116_s26 = sld [smem:[#allocation20_spill]] }
 0x2f4   : > { %p1848_p8 = scmp.ge.s32.totalorder %s3114_s28, 2  ;;  %s1621_s21 = sand.u32 1, %s3115_s30  }
 0x2f5   : > { %p3117_p7 = scmp.ne.s32.totalorder %s3116_s26, 0  ;;  %s1622_s11 = scalar_lea.sflag [#allocation9], %s1621_s21 }
 0x2f7   : > { %p1842_p4 = pnand %p1848_p8, %p3117_p7 }
 0x2f9   : > { %2086 = dma.done.wait (!%p1842_p4), %s1622_s11, 256  }
 0x2fa   : > { %2088 = vsyncadd (!%p1842_p4), %s1622_s11, 4294967040  ;;  %s21_s3 = sadd.s32 1, %s3114_s28   ;;  %s3118_s2 = smov %s2314_s14 }
 0x2fb   : > { %p18_p13 = scmp.ge.s32.totalorder %s21_s3, 10   ;;  %s3119_s20 = sld [smem:[#allocation17_spill]] }
 0x2fc   : > { %s3120_s21 = sld [smem:[#allocation21_spill]]  ;;  %s3121_s14 = smov %s2095_s15 }
 0x2fd   : > { %s3122_s15 = smov %s2099_s16  ;;  %s3123_s16 = smov %s3118_s2 }
 0x2fe   : > { %s3124_s17 = smov %s2107_s18  ;;  %s3125_s18 = smov %s2111_s19 }
 0x2ff   : > { %s3126_s19 = smov %s2319_s23  ;;  %s3127_s2 = smov %s2127_s22 }
 0x300   : > { %s3128_s22 = smov %s3135_s10  ;;  %s3129_s23 = smov %s21_s3 }
 0x301   :  { %20 = sbr.rel (!%p18_p13) target bundleno = 14 (0xe), region = 90 }
 0x308   :  { %1627 = vsyncpa [#allocation8], 1 }
 0x309   :  { %1629 = vsyncpa [#allocation8 + $0x1], 1 }
 0x30a   :  { %1630 = vsyncpa [#allocation9], 1 }
 0x30b   :  { %1632 = vsyncpa [#allocation9 + $0x1], 1 }
 0x30c   :  { %1633 = vsyncpa [#allocation10], 1 }
 0x30d   :  { %1635 = vsyncpa [#allocation10 + $0x1], 1 }

</bundles_post_ra>
